<compile_context>
chip_gen: v5e
topology: v5e:2x2
jax: 0.10.0
libtpu: 0.0.40
codegen_flags: <defaults>
</compile_context>

<pallas_src>
import functools
import math

import jax
import jax.numpy as jnp
from jax import lax
from jax.experimental import pallas as pl
from jax.experimental.pallas import tpu as pltpu


def _round_up(n, m):
    return ((n + m - 1) // m) * m


def _audio_encoder_kernel(x_ref, w0_ref, b0_ref, w1_ref, b1_ref,
                          wqkv_ref, bqkv_ref, wp_ref, bp_ref,
                          out_ref, attn_ref, *, bb, seq, hp):
    # [bb, S, Dp] bf16 -> [bb*S, Dp]; S and Dp are multiples of the (8,128)
    # layout, so this collapse is layout-preserving (no VMEM copy).
    x = x_ref[...].reshape(bb * seq, x_ref.shape[-1])

    # Feature layers: Linear -> ReLU (-> Dropout = identity in eval mode).
    # bf16 operands into the MXU, f32 accumulation, f32 bias add.
    h = jnp.dot(x, w0_ref[...], preferred_element_type=jnp.float32) + b0_ref[...]
    h = jnp.maximum(h, 0.0).astype(jnp.bfloat16)
    h = jnp.dot(h, w1_ref[...], preferred_element_type=jnp.float32) + b1_ref[...]
    h = jnp.maximum(h, 0.0).astype(jnp.bfloat16)

    # Fused Q|K|V projection (1/sqrt(hidden) is pre-folded into the Q slice).
    qkv = (jnp.dot(h, wqkv_ref[...], preferred_element_type=jnp.float32)
           + bqkv_ref[...]).astype(jnp.bfloat16)                     # [bb*S, 3*Hp]

    for b in range(bb):                    # small static loop over the batch block
        rows = slice(b * seq, (b + 1) * seq)
        q = qkv[rows, :hp]
        k = qkv[rows, hp:2 * hp]

        # energy = (Q/sqrt(H)) @ K^T : contract the (zero-padded, hence exact)
        # hidden axis without an explicit transpose.
        energy = lax.dot_general(q, k, dimension_numbers=(((1,), (1,)), ((), ())),
                                 preferred_element_type=jnp.float32)  # [S, S]

        # Numerically-stable softmax; divide -> EUP reciprocal + VPU multiply.
        m = jnp.max(energy, axis=-1, keepdims=True)
        p = jnp.exp(energy - m)
        inv = pl.reciprocal(jnp.sum(p, axis=-1, keepdims=True), approx=True)
        attn = p * inv
        attn_ref[b] = attn.astype(attn_ref.dtype)    # store early (frees energy/p)

        v = qkv[rows, 2 * hp:]
        ctx = jnp.dot(attn.astype(jnp.bfloat16), v,
                      preferred_element_type=jnp.float32)             # [S, Hp]
        out = jnp.dot(ctx.astype(jnp.bfloat16), wp_ref[...],
                      preferred_element_type=jnp.float32) + bp_ref[...]
        out_ref[b] = out.astype(out_ref.dtype)


def prepare_audio_encoder_params(w0, b0, w1, b1, wq, bq, wk, bk, wv, bv, wp, bp,
                                 *, lane=128):
    """One-time parameter prep: lane-pad, fold 1/sqrt(H) into Q, fuse Q|K|V, cast
    weights to bf16 (biases stay f32). Weights are stored [in, out]."""
    d_in, hidden = w0.shape
    dp, hp = _round_up(d_in, lane), _round_up(hidden, lane)
    inv_scale = 1.0 / math.sqrt(float(hidden))

    def pw(w, rows, cols):  # padded bf16 weight
        return jnp.pad(w, ((0, rows - w.shape[0]),
                           (0, cols - w.shape[1]))).astype(jnp.bfloat16)

    def pb(v, cols):        # padded f32 bias, shaped [1, cols]
        return jnp.pad(v, (0, cols - v.shape[0])).reshape(1, cols).astype(jnp.float32)

    return dict(
        d_in=d_in, hidden=hidden, dp=dp, hp=hp,
        w0=pw(w0, dp, hp), b0=pb(b0, hp),
        w1=pw(w1, hp, hp), b1=pb(b1, hp),
        wqkv=jnp.concatenate(
            [pw(wq * inv_scale, hp, hp), pw(wk, hp, hp), pw(wv, hp, hp)], axis=1),
        bqkv=jnp.concatenate(
            [pb(bq * inv_scale, hp), pb(bk, hp), pb(bv, hp)], axis=1),
        wp=pw(wp, hp, hp), bp=pb(bp, hp),
    )


def audio_encoder_forward(x, params, *, batch_block=2):
    """x: [B, S, D_in] f32. Returns (projected [B, S, H] f32, attn [B, S, S] f32)."""
    B, S, d_in = x.shape
    dp, hp, hidden = params["dp"], params["hp"], params["hidden"]
    assert d_in == params["d_in"]

    bb = min(batch_block, B)
    while B % bb:            # largest divisor of B not exceeding batch_block
        bb -= 1

    # Input pad + bf16 cast (halves the x DMA; padding is exact).
    xp = jnp.pad(x, ((0, 0), (0, 0), (0, dp - d_in))).astype(jnp.bfloat16)

    # Weights/biases: constant index_map -> stay resident in VMEM across the grid.
    wspec = lambda r, c: pl.BlockSpec((r, c), lambda i: (0, 0))
    kernel = functools.partial(_audio_encoder_kernel, bb=bb, seq=S, hp=hp)

    out_p, attn = pl.pallas_call(
        kernel,
        out_shape=(jax.ShapeDtypeStruct((B, S, hp), jnp.float32),
                   jax.ShapeDtypeStruct((B, S, S), jnp.float32)),
        grid=(B // bb,),
        in_specs=[
            pl.BlockSpec((bb, S, dp), lambda i: (i, 0, 0)),   # x block
            wspec(dp, hp), wspec(1, hp),                      # feature layer 0
            wspec(hp, hp), wspec(1, hp),                      # feature layer 1
            wspec(hp, 3 * hp), wspec(1, 3 * hp),              # fused Q|K|V
            wspec(hp, hp), wspec(1, hp),                      # projection
        ],
        out_specs=(pl.BlockSpec((bb, S, hp), lambda i: (i, 0, 0)),
                   pl.BlockSpec((bb, S, S), lambda i: (i, 0, 0))),
        compiler_params=pltpu.CompilerParams(
            dimension_semantics=("parallel",)),               # megacore on v7x
    )(xp, params["w0"], params["b0"], params["w1"], params["b1"],
      params["wqkv"], params["bqkv"], params["wp"], params["bp"])

    return out_p[:, :, :hidden], attn


if __name__ == "__main__":
    # Small shapes consistent with the module: batch=4, seq=128 (lane-dense
    # attention output), input_dim=32, hidden_dim=64.
    B, S, D_IN, HID = 4, 128, 32, 64

    key = jax.random.PRNGKey(0)
    keys = jax.random.split(key, 13)

    x = jax.random.normal(keys[0], (B, S, D_IN), dtype=jnp.float32)

    def lin(kw, kb, din, dout):
        w = jax.random.normal(kw, (din, dout), dtype=jnp.float32) * 0.1
        b = jax.random.normal(kb, (dout,), dtype=jnp.float32) * 0.1
        return w, b

    w0, b0 = lin(keys[1], keys[2], D_IN, HID)
    w1, b1 = lin(keys[3], keys[4], HID, HID)
    wq, bq = lin(keys[5], keys[6], HID, HID)
    wk, bk = lin(keys[7], keys[8], HID, HID)
    wv, bv = lin(keys[9], keys[10], HID, HID)
    wp, bp = lin(keys[11], keys[12], HID, HID)

    # One-time parameter prep (pad / fuse / fold scale / cast) outside the fwd path.
    params = prepare_audio_encoder_params(w0, b0, w1, b1, wq, bq, wk, bk,
                                          wv, bv, wp, bp)

    out, attn = audio_encoder_forward(x, params, batch_block=2)
    out = jax.block_until_ready(out)
    attn = jax.block_until_ready(attn)

    # Pure-JAX f32 reference (same semantics as the PyTorch AudioEncoder in eval mode).
    h = jnp.maximum(x @ w0 + b0, 0.0)
    h = jnp.maximum(h @ w1 + b1, 0.0)
    Q = h @ wq + bq
    K = h @ wk + bk
    V = h @ wv + bv
    energy = jnp.einsum("bsh,bth->bst", Q, K) / jnp.sqrt(jnp.float32(HID))
    attn_ref = jax.nn.softmax(energy, axis=-1)
    out_ref = jnp.einsum("bst,bth->bsh", attn_ref, V) @ wp + bp

    assert out.shape == (B, S, HID)
    assert attn.shape == (B, S, S)
    # Tolerances account for bf16 MXU operands + approx reciprocal.
    assert jnp.allclose(out, out_ref, atol=2e-2, rtol=2e-2), "output mismatch vs reference"
    assert jnp.allclose(attn, attn_ref, atol=1e-2, rtol=1e-2), "attention mismatch vs reference"

    print("KERNEL_OK")
</pallas_src>

<mosaic_0001>
module attributes {stable_mosaic.version = 11 : i64} {
  func.func @_audio_encoder_kernel(%arg0: i32, %arg1: memref<2x128x128xbf16, #tpu.memory_space<vmem>>, %arg2: memref<128x128xbf16, #tpu.memory_space<vmem>>, %arg3: memref<1x128xf32, #tpu.memory_space<vmem>>, %arg4: memref<128x128xbf16, #tpu.memory_space<vmem>>, %arg5: memref<1x128xf32, #tpu.memory_space<vmem>>, %arg6: memref<128x384xbf16, #tpu.memory_space<vmem>>, %arg7: memref<1x384xf32, #tpu.memory_space<vmem>>, %arg8: memref<128x128xbf16, #tpu.memory_space<vmem>>, %arg9: memref<1x128xf32, #tpu.memory_space<vmem>>, %arg10: memref<2x128x128xf32, #tpu.memory_space<vmem>>, %arg11: memref<2x128x128xf32, #tpu.memory_space<vmem>>) attributes {dimension_semantics = [#tpu.dimension_semantics<parallel>], iteration_bounds = array<i64: 2>, scalar_prefetch = 0 : i64, scratch_operands = 0 : i64, tpu.core_type = #tpu.core_type<tc>, window_params = [{transform_indices = @transform_0, window_bounds = array<i64: 2, 128, 128>}, {pipeline_mode = #tpu.pipeline_mode<synchronous>, transform_indices = @transform_1, window_bounds = array<i64: 128, 128>}, {pipeline_mode = #tpu.pipeline_mode<synchronous>, transform_indices = @transform_2, window_bounds = array<i64: 1, 128>}, {pipeline_mode = #tpu.pipeline_mode<synchronous>, transform_indices = @transform_3, window_bounds = array<i64: 128, 128>}, {pipeline_mode = #tpu.pipeline_mode<synchronous>, transform_indices = @transform_4, window_bounds = array<i64: 1, 128>}, {pipeline_mode = #tpu.pipeline_mode<synchronous>, transform_indices = @transform_5, window_bounds = array<i64: 128, 384>}, {pipeline_mode = #tpu.pipeline_mode<synchronous>, transform_indices = @transform_6, window_bounds = array<i64: 1, 384>}, {pipeline_mode = #tpu.pipeline_mode<synchronous>, transform_indices = @transform_7, window_bounds = array<i64: 128, 128>}, {pipeline_mode = #tpu.pipeline_mode<synchronous>, transform_indices = @transform_8, window_bounds = array<i64: 1, 128>}, {transform_indices = @transform_9, window_bounds = array<i64: 2, 128, 128>}, {transform_indices = @transform_10, window_bounds = array<i64: 2, 128, 128>}]} {
    %c0 = arith.constant 0 : index
    %c0_0 = arith.constant 0 : index
    %c0_1 = arith.constant 0 : index
    %0 = vector.load %arg1[%c0, %c0_0, %c0_1] : memref<2x128x128xbf16, #tpu.memory_space<vmem>>, vector<2x128x128xbf16>
    %1 = vector.shape_cast %0 : vector<2x128x128xbf16> to vector<256x128xbf16>
    %c0_2 = arith.constant 0 : index
    %c0_3 = arith.constant 0 : index
    %2 = vector.load %arg2[%c0_2, %c0_3] : memref<128x128xbf16, #tpu.memory_space<vmem>>, vector<128x128xbf16>
    %cst = arith.constant dense<0.000000e+00> : vector<256x128xf32>
    %3 = tpu.matmul %1, %2, %cst {dimension_numbers = #tpu.dot_dimension_numbers<[1], [0], [0], [1], [0, 0, 1, 1], [], []>} : vector<256x128xbf16>, vector<128x128xbf16>, vector<256x128xf32> -> vector<256x128xf32>
    %c0_4 = arith.constant 0 : index
    %c0_5 = arith.constant 0 : index
    %4 = vector.load %arg3[%c0_4, %c0_5] : memref<1x128xf32, #tpu.memory_space<vmem>>, vector<1x128xf32>
    %5 = vector.broadcast %4 : vector<1x128xf32> to vector<256x128xf32>
    %6 = arith.addf %3, %5 : vector<256x128xf32>
    %cst_6 = arith.constant 0.000000e+00 : f32
    %7 = vector.broadcast %cst_6 : f32 to vector<256x128xf32>
    %8 = arith.maximumf %6, %7 : vector<256x128xf32>
    %9 = arith.truncf %8 : vector<256x128xf32> to vector<256x128xbf16>
    %c0_7 = arith.constant 0 : index
    %c0_8 = arith.constant 0 : index
    %10 = vector.load %arg4[%c0_7, %c0_8] : memref<128x128xbf16, #tpu.memory_space<vmem>>, vector<128x128xbf16>
    %cst_9 = arith.constant dense<0.000000e+00> : vector<256x128xf32>
    %11 = tpu.matmul %9, %10, %cst_9 {dimension_numbers = #tpu.dot_dimension_numbers<[1], [0], [0], [1], [0, 0, 1, 1], [], []>} : vector<256x128xbf16>, vector<128x128xbf16>, vector<256x128xf32> -> vector<256x128xf32>
    %c0_10 = arith.constant 0 : index
    %c0_11 = arith.constant 0 : index
    %12 = vector.load %arg5[%c0_10, %c0_11] : memref<1x128xf32, #tpu.memory_space<vmem>>, vector<1x128xf32>
    %13 = vector.broadcast %12 : vector<1x128xf32> to vector<256x128xf32>
    %14 = arith.addf %11, %13 : vector<256x128xf32>
    %cst_12 = arith.constant 0.000000e+00 : f32
    %15 = vector.broadcast %cst_12 : f32 to vector<256x128xf32>
    %16 = arith.maximumf %14, %15 : vector<256x128xf32>
    %17 = arith.truncf %16 : vector<256x128xf32> to vector<256x128xbf16>
    %c0_13 = arith.constant 0 : index
    %c0_14 = arith.constant 0 : index
    %18 = vector.load %arg6[%c0_13, %c0_14] : memref<128x384xbf16, #tpu.memory_space<vmem>>, vector<128x384xbf16>
    %cst_15 = arith.constant dense<0.000000e+00> : vector<256x384xf32>
    %19 = tpu.matmul %17, %18, %cst_15 {dimension_numbers = #tpu.dot_dimension_numbers<[1], [0], [0], [1], [0, 0, 1, 1], [], []>} : vector<256x128xbf16>, vector<128x384xbf16>, vector<256x384xf32> -> vector<256x384xf32>
    %c0_16 = arith.constant 0 : index
    %c0_17 = arith.constant 0 : index
    %20 = vector.load %arg7[%c0_16, %c0_17] : memref<1x384xf32, #tpu.memory_space<vmem>>, vector<1x384xf32>
    %21 = vector.broadcast %20 : vector<1x384xf32> to vector<256x384xf32>
    %22 = arith.addf %19, %21 : vector<256x384xf32>
    %23 = arith.truncf %22 : vector<256x384xf32> to vector<256x384xbf16>
    %24 = vector.extract_strided_slice %23 {offsets = [0, 0], sizes = [128, 128], strides = [1, 1]} : vector<256x384xbf16> to vector<128x128xbf16>
    %25 = vector.extract_strided_slice %23 {offsets = [0, 128], sizes = [128, 128], strides = [1, 1]} : vector<256x384xbf16> to vector<128x128xbf16>
    %cst_18 = arith.constant dense<0.000000e+00> : vector<128x128xf32>
    %26 = tpu.matmul %24, %25, %cst_18 {dimension_numbers = #tpu.dot_dimension_numbers<[1], [1], [0], [0], [0, 0, 1, 0], [], []>} : vector<128x128xbf16>, vector<128x128xbf16>, vector<128x128xf32> -> vector<128x128xf32>
    %cst_19 = arith.constant dense<0xFF800000> : vector<128xf32>
    %27 = vector.multi_reduction <maximumf>, %26, %cst_19 [1] : vector<128x128xf32> to vector<128xf32>
    %28 = vector.shape_cast %27 : vector<128xf32> to vector<128x1xf32>
    %29 = vector.broadcast %28 : vector<128x1xf32> to vector<128x128xf32>
    %30 = arith.subf %26, %29 : vector<128x128xf32>
    %31 = math.exp %30 : vector<128x128xf32>
    %cst_20 = arith.constant dense<0.000000e+00> : vector<128xf32>
    %32 = vector.multi_reduction <add>, %31, %cst_20 [1] : vector<128x128xf32> to vector<128xf32>
    %33 = vector.shape_cast %32 : vector<128xf32> to vector<128x1xf32>
    %34 = tpu.reciprocal %33 {approx = true} : vector<128x1xf32> -> vector<128x1xf32>
    %35 = vector.broadcast %34 : vector<128x1xf32> to vector<128x128xf32>
    %36 = arith.mulf %31, %35 : vector<128x128xf32>
    %c0_21 = arith.constant 0 : index
    %c0_22 = arith.constant 0 : index
    %c0_23 = arith.constant 0 : index
    %37 = vector.load %arg11[%c0_21, %c0_22, %c0_23] : memref<2x128x128xf32, #tpu.memory_space<vmem>>, vector<1x128x128xf32>
    %38 = vector.shape_cast %37 : vector<1x128x128xf32> to vector<128x128xf32>
    %39 = vector.shape_cast %36 : vector<128x128xf32> to vector<1x128x128xf32>
    tpu.vector_store %arg11[%c0_21, %c0_22, %c0_23], %39 {strides = array<i32>} : memref<2x128x128xf32, #tpu.memory_space<vmem>>, vector<1x128x128xf32>,
    %40 = vector.extract_strided_slice %23 {offsets = [0, 256], sizes = [128, 128], strides = [1, 1]} : vector<256x384xbf16> to vector<128x128xbf16>
    %41 = arith.truncf %36 : vector<128x128xf32> to vector<128x128xbf16>
    %cst_24 = arith.constant dense<0.000000e+00> : vector<128x128xf32>
    %42 = tpu.matmul %41, %40, %cst_24 {dimension_numbers = #tpu.dot_dimension_numbers<[1], [0], [0], [1], [0, 0, 1, 1], [], []>} : vector<128x128xbf16>, vector<128x128xbf16>, vector<128x128xf32> -> vector<128x128xf32>
    %43 = arith.truncf %42 : vector<128x128xf32> to vector<128x128xbf16>
    %c0_25 = arith.constant 0 : index
    %c0_26 = arith.constant 0 : index
    %44 = vector.load %arg8[%c0_25, %c0_26] : memref<128x128xbf16, #tpu.memory_space<vmem>>, vector<128x128xbf16>
    %cst_27 = arith.constant dense<0.000000e+00> : vector<128x128xf32>
    %45 = tpu.matmul %43, %44, %cst_27 {dimension_numbers = #tpu.dot_dimension_numbers<[1], [0], [0], [1], [0, 0, 1, 1], [], []>} : vector<128x128xbf16>, vector<128x128xbf16>, vector<128x128xf32> -> vector<128x128xf32>
    %c0_28 = arith.constant 0 : index
    %c0_29 = arith.constant 0 : index
    %46 = vector.load %arg9[%c0_28, %c0_29] : memref<1x128xf32, #tpu.memory_space<vmem>>, vector<1x128xf32>
    %47 = vector.broadcast %46 : vector<1x128xf32> to vector<128x128xf32>
    %48 = arith.addf %45, %47 : vector<128x128xf32>
    %c0_30 = arith.constant 0 : index
    %c0_31 = arith.constant 0 : index
    %c0_32 = arith.constant 0 : index
    %49 = vector.load %arg10[%c0_30, %c0_31, %c0_32] : memref<2x128x128xf32, #tpu.memory_space<vmem>>, vector<1x128x128xf32>
    %50 = vector.shape_cast %49 : vector<1x128x128xf32> to vector<128x128xf32>
    %51 = vector.shape_cast %48 : vector<128x128xf32> to vector<1x128x128xf32>
    tpu.vector_store %arg10[%c0_30, %c0_31, %c0_32], %51 {strides = array<i32>} : memref<2x128x128xf32, #tpu.memory_space<vmem>>, vector<1x128x128xf32>,
    %52 = vector.extract_strided_slice %23 {offsets = [128, 0], sizes = [128, 128], strides = [1, 1]} : vector<256x384xbf16> to vector<128x128xbf16>
    %53 = vector.extract_strided_slice %23 {offsets = [128, 128], sizes = [128, 128], strides = [1, 1]} : vector<256x384xbf16> to vector<128x128xbf16>
    %cst_33 = arith.constant dense<0.000000e+00> : vector<128x128xf32>
    %54 = tpu.matmul %52, %53, %cst_33 {dimension_numbers = #tpu.dot_dimension_numbers<[1], [1], [0], [0], [0, 0, 1, 0], [], []>} : vector<128x128xbf16>, vector<128x128xbf16>, vector<128x128xf32> -> vector<128x128xf32>
    %cst_34 = arith.constant dense<0xFF800000> : vector<128xf32>
    %55 = vector.multi_reduction <maximumf>, %54, %cst_34 [1] : vector<128x128xf32> to vector<128xf32>
    %56 = vector.shape_cast %55 : vector<128xf32> to vector<128x1xf32>
    %57 = vector.broadcast %56 : vector<128x1xf32> to vector<128x128xf32>
    %58 = arith.subf %54, %57 : vector<128x128xf32>
    %59 = math.exp %58 : vector<128x128xf32>
    %cst_35 = arith.constant dense<0.000000e+00> : vector<128xf32>
    %60 = vector.multi_reduction <add>, %59, %cst_35 [1] : vector<128x128xf32> to vector<128xf32>
    %61 = vector.shape_cast %60 : vector<128xf32> to vector<128x1xf32>
    %62 = tpu.reciprocal %61 {approx = true} : vector<128x1xf32> -> vector<128x1xf32>
    %63 = vector.broadcast %62 : vector<128x1xf32> to vector<128x128xf32>
    %64 = arith.mulf %59, %63 : vector<128x128xf32>
    %c1 = arith.constant 1 : index
    %c0_36 = arith.constant 0 : index
    %c0_37 = arith.constant 0 : index
    %65 = vector.load %arg11[%c1, %c0_36, %c0_37] : memref<2x128x128xf32, #tpu.memory_space<vmem>>, vector<1x128x128xf32>
    %66 = vector.shape_cast %65 : vector<1x128x128xf32> to vector<128x128xf32>
    %67 = vector.shape_cast %64 : vector<128x128xf32> to vector<1x128x128xf32>
    tpu.vector_store %arg11[%c1, %c0_36, %c0_37], %67 {strides = array<i32>} : memref<2x128x128xf32, #tpu.memory_space<vmem>>, vector<1x128x128xf32>,
    %68 = vector.extract_strided_slice %23 {offsets = [128, 256], sizes = [128, 128], strides = [1, 1]} : vector<256x384xbf16> to vector<128x128xbf16>
    %69 = arith.truncf %64 : vector<128x128xf32> to vector<128x128xbf16>
    %cst_38 = arith.constant dense<0.000000e+00> : vector<128x128xf32>
    %70 = tpu.matmul %69, %68, %cst_38 {dimension_numbers = #tpu.dot_dimension_numbers<[1], [0], [0], [1], [0, 0, 1, 1], [], []>} : vector<128x128xbf16>, vector<128x128xbf16>, vector<128x128xf32> -> vector<128x128xf32>
    %71 = arith.truncf %70 : vector<128x128xf32> to vector<128x128xbf16>
    %c0_39 = arith.constant 0 : index
    %c0_40 = arith.constant 0 : index
    %72 = vector.load %arg8[%c0_39, %c0_40] : memref<128x128xbf16, #tpu.memory_space<vmem>>, vector<128x128xbf16>
    %cst_41 = arith.constant dense<0.000000e+00> : vector<128x128xf32>
    %73 = tpu.matmul %71, %72, %cst_41 {dimension_numbers = #tpu.dot_dimension_numbers<[1], [0], [0], [1], [0, 0, 1, 1], [], []>} : vector<128x128xbf16>, vector<128x128xbf16>, vector<128x128xf32> -> vector<128x128xf32>
    %c0_42 = arith.constant 0 : index
    %c0_43 = arith.constant 0 : index
    %74 = vector.load %arg9[%c0_42, %c0_43] : memref<1x128xf32, #tpu.memory_space<vmem>>, vector<1x128xf32>
    %75 = vector.broadcast %74 : vector<1x128xf32> to vector<128x128xf32>
    %76 = arith.addf %73, %75 : vector<128x128xf32>
    %c1_44 = arith.constant 1 : index
    %c0_45 = arith.constant 0 : index
    %c0_46 = arith.constant 0 : index
    %77 = vector.load %arg10[%c1_44, %c0_45, %c0_46] : memref<2x128x128xf32, #tpu.memory_space<vmem>>, vector<1x128x128xf32>
    %78 = vector.shape_cast %77 : vector<1x128x128xf32> to vector<128x128xf32>
    %79 = vector.shape_cast %76 : vector<128x128xf32> to vector<1x128x128xf32>
    tpu.vector_store %arg10[%c1_44, %c0_45, %c0_46], %79 {strides = array<i32>} : memref<2x128x128xf32, #tpu.memory_space<vmem>>, vector<1x128x128xf32>,
    return
  }
  func.func @transform_0(%arg0: i32) -> (i32, i32, i32) {
    %c0_i32 = arith.constant 0 : i32
    %c0_i32_0 = arith.constant 0 : i32
    %c0_i32_1 = arith.constant 0 : i32
    return %arg0, %c0_i32, %c0_i32_0 : i32, i32, i32
  }
  func.func @transform_1(%arg0: i32) -> (i32, i32) {
    %c0_i32 = arith.constant 0 : i32
    %c0_i32_0 = arith.constant 0 : i32
    %c0_i32_1 = arith.constant 0 : i32
    return %c0_i32, %c0_i32_0 : i32, i32
  }
  func.func @transform_2(%arg0: i32) -> (i32, i32) {
    %c0_i32 = arith.constant 0 : i32
    %c0_i32_0 = arith.constant 0 : i32
    %c0_i32_1 = arith.constant 0 : i32
    return %c0_i32, %c0_i32_0 : i32, i32
  }
  func.func @transform_3(%arg0: i32) -> (i32, i32) {
    %c0_i32 = arith.constant 0 : i32
    %c0_i32_0 = arith.constant 0 : i32
    %c0_i32_1 = arith.constant 0 : i32
    return %c0_i32, %c0_i32_0 : i32, i32
  }
  func.func @transform_4(%arg0: i32) -> (i32, i32) {
    %c0_i32 = arith.constant 0 : i32
    %c0_i32_0 = arith.constant 0 : i32
    %c0_i32_1 = arith.constant 0 : i32
    return %c0_i32, %c0_i32_0 : i32, i32
  }
  func.func @transform_5(%arg0: i32) -> (i32, i32) {
    %c0_i32 = arith.constant 0 : i32
    %c0_i32_0 = arith.constant 0 : i32
    %c0_i32_1 = arith.constant 0 : i32
    return %c0_i32, %c0_i32_0 : i32, i32
  }
  func.func @transform_6(%arg0: i32) -> (i32, i32) {
    %c0_i32 = arith.constant 0 : i32
    %c0_i32_0 = arith.constant 0 : i32
    %c0_i32_1 = arith.constant 0 : i32
    return %c0_i32, %c0_i32_0 : i32, i32
  }
  func.func @transform_7(%arg0: i32) -> (i32, i32) {
    %c0_i32 = arith.constant 0 : i32
    %c0_i32_0 = arith.constant 0 : i32
    %c0_i32_1 = arith.constant 0 : i32
    return %c0_i32, %c0_i32_0 : i32, i32
  }
  func.func @transform_8(%arg0: i32) -> (i32, i32) {
    %c0_i32 = arith.constant 0 : i32
    %c0_i32_0 = arith.constant 0 : i32
    %c0_i32_1 = arith.constant 0 : i32
    return %c0_i32, %c0_i32_0 : i32, i32
  }
  func.func @transform_9(%arg0: i32) -> (i32, i32, i32) {
    %c0_i32 = arith.constant 0 : i32
    %c0_i32_0 = arith.constant 0 : i32
    %c0_i32_1 = arith.constant 0 : i32
    return %arg0, %c0_i32, %c0_i32_0 : i32, i32, i32
  }
  func.func @transform_10(%arg0: i32) -> (i32, i32, i32) {
    %c0_i32 = arith.constant 0 : i32
    %c0_i32_0 = arith.constant 0 : i32
    %c0_i32_1 = arith.constant 0 : i32
    return %arg0, %c0_i32, %c0_i32_0 : i32, i32, i32
  }
}

</mosaic_0001>

<bundles_post_ra>
// kernel: tpu_custom_call.1
= control target key start
LH: loop header
LB: loop body
LE: loop exit
PB: predicated region body
PF: predicated region fallthrough
CT: control target
= control target key end

     0   :  { %s4702_s0 = inlined_call_operand.hbm [shape: bf16[4,128,128], index: 0, kind: input, shape index: {}]   ;;  %s4703_s1 = inlined_call_operand.hbm [shape: bf16[128,128], index: 1, kind: input, shape index: {}]   ;;  %s4704_s2 = inlined_call_operand.vmem [shape: f32[1,128], index: 2, kind: input, shape index: {}]   ;;  %s4705_s3 = inlined_call_operand.hbm [shape: bf16[128,128], index: 3, kind: input, shape index: {}]   ;;  %s4706_s4 = inlined_call_operand.vmem [shape: f32[1,128], index: 4, kind: input, shape index: {}]   ;;  %s4707_s5 = inlined_call_operand.hbm [shape: bf16[128,384], index: 5, kind: input, shape index: {}]   ;;  %s4708_s6 = inlined_call_operand.vmem [shape: f32[1,384], index: 6, kind: input, shape index: {}]   ;;  %s4709_s7 = inlined_call_operand.hbm [shape: bf16[128,128], index: 7, kind: input, shape index: {}]   ;;  %s4710_s8 = inlined_call_operand.vmem [shape: f32[1,128], index: 8, kind: input, shape index: {}]   ;;  %s4711_s9 = inlined_call_operand.hbm [shape: f32[4,128,128], index: 9, kind: output, shape index: {0}]   ;;  %s4712_s10 = inlined_call_operand.hbm [shape: f32[4,128,128], index: 10, kind: output, shape index: {1}]  }
   0x1   :  { %4718 = sst [smem:[#allocation21_spill]] %s4703_s1 }
   0x2   :  { %4719 = sst [smem:[#allocation22_spill]] %s4705_s3 }
   0x3   :  { %4720 = sst [smem:[#allocation23_spill]] %s4707_s5 }
   0x4   :  { %4721 = sst [smem:[#allocation24_spill]] %s4709_s7 }
   0x5   :  { %16 = vsyncpa [#allocation3], 0 }
   0x6   :  { %18 = vsyncpa [#allocation3 + $0x1], 0 }
   0x7   :  { %19 = vsyncpa [#allocation6], 0 }
   0x8   :  { %20 = vsyncpa [#allocation9], 0 }
   0x9   :  { %21 = vsyncpa [#allocation4], 0 }
   0xa   :  { %23 = vsyncpa [#allocation4 + $0x1], 0 }
   0xb   :  { %24 = vsyncpa [#allocation13], 0 }
   0xc   :  { %26 = vsyncpa [#allocation13 + $0x1], 0  ;;  %s3734_s13 = smov 0   ;;  %s3736_s14 = smov 0  }
   0xd   :  { %s3738_s15 = smov 0   ;;  %s3740_s16 = smov 0  }
   0xe LB: > { %4722 = sst [smem:[#allocation19_spill]] %s3663_s15  ;;  %s3755_s17 = sadd.s32 4294967295, %s3667_s16   ;;  %s3667_s16 = sphi %s3740_s16, %s4743_s16   ;;  %s3663_s15 = sphi %s3738_s15, %s4740_s15   ;;  %s3659_s14 = sphi %s3736_s14, %s4742_s14   ;;  %s3655_s13 = sphi %s3734_s13, %s4741_s13  }
   0xf   : > { %s2754_s18 = sadd.s32 4294967294, %s3667_s16   ;;  %p52_p0 = scmp.ne.s32.totalorder %s3659_s14, %s3655_s13 }
  0x10   : > { %p53_p1 = scmp.eq.s32.totalorder %s3755_s17, 0  ;;  %p244_p2 = scmp.eq.s32.totalorder %s3755_s17, 1 }
  0x11   : > { %p250_p3 = scmp.eq.s32.totalorder %s2754_s18, 1  ;;  %p2755_p5 = scmp.ge.s32.totalorder %s3667_s16, 1 }
  0x12   : > { %p3764_p4 = por %p53_p1, %p52_p0  ;;  %p283_p7 = scmp.lt.s32.totalorder %s3667_s16, 3 }
  0x13   : > { %p3769_p6 = por %p250_p3, %p52_p0  ;;  %s4725_s1 = sld [smem:[#allocation21_spill]] }
  0x14   : > { %p3777_p8 = pnand %p2755_p5, %p283_p7  ;;  %s3669_s25 = smov [#allocation5]  }
  0x15   : > { %s296_s26 = sshll.u32 %s3669_s25, 4  ;;  %s4728_s5 = sld [smem:[#allocation23_spill]]  ;;  %s297_s26 = int_to_ptr.vmem [resolvable:$true] %s296_s26 }
  0x16   : > { %p3203_p9 = pneg %p3777_p8  ;;  %s4713_s11 = smov 64  }
  0x17   : > { %s4715_s12 = smov 4   ;;  %s3672_s18 = smov [#allocation8]  }
  0x18   : > { %p3785_p10 = pnand %p3203_p9, %p53_p1  ;;  %s330_s21 = sshll.u32 %s3672_s18, 4  ;;  %s331_s21 = int_to_ptr.vmem [resolvable:$true] %s330_s21 }
  0x19   : > { %s294_s23 = sshll.u32 %s4725_s1, 4  ;;  %s3673_s22 = smov 192   ;;  %s295_s23 = int_to_ptr.hbm [resolvable:$true] %s294_s23 }
  0x1a   : > { %3206 = dma.hbm_to_vmem [thread:$0]  (!%p3785_p10), %s295_s23, 1024, %s297_s26, [#allocation6], %s4713_s11, %s4713_s11, %s4715_s12  }
  0x1b   : > { %s328_s30 = sshll.u32 %s4728_s5, 4  ;;  %s3674_s25 = smov 12   ;;  %s329_s30 = int_to_ptr.hbm [resolvable:$true] %s328_s30 }
  0x1c   : > { %3212 = dma.hbm_to_vmem [thread:$0]  (!%p3785_p10), %s329_s30, 3072, %s331_s21, [#allocation9], %s3673_s22, %s3673_s22, %s3674_s25  }
  0x1d   : > { %s4729_s3 = sld [smem:[#allocation22_spill]]  ;;  %s3675_s23 = smov [#allocation7]  }
  0x1e   : > { %s313_s26 = sshll.u32 %s3675_s23, 4  ;;  %s4730_s7 = sld [smem:[#allocation24_spill]]  ;;  %s314_s26 = int_to_ptr.vmem [resolvable:$true] %s313_s26 }
  0x1f   : > { %s4731_s30 = smov 4   ;;  %s4732_s21 = smov 64  }
  0x20   : > { %s3676_s22 = smov [#allocation10]   ;;  %s3817_s28 = sadd.s32 1, %s3667_s16  }
  0x21   : > { %s347_s25 = sshll.u32 %s3676_s22, 4  ;;  %s39_s11 = sadd.s32 1, %s3663_s15  ;;  %s348_s25 = int_to_ptr.vmem [resolvable:$true] %s347_s25 }
  0x22   : > { %s36_s29 = ssub.s32 %s3667_s16, %s3817_s28  ;;  %p46_p12 = scmp.ne.s32.totalorder %s3663_s15, %s3659_s14 }
  0x23   : > { %s311_s1 = sshll.u32 %s4729_s3, 4  ;;  %p37_p13 = scmp.eq.s32.totalorder %s36_s29, 0  ;;  %s312_s1 = int_to_ptr.hbm [resolvable:$true] %s311_s1 }
  0x24   : > { %s345_s12 = sshll.u32 %s4730_s7, 4  ;;  %p47_p0 = scmp.eq.s32.totalorder %s3667_s16, 0  ;;  %s346_s12 = int_to_ptr.hbm [resolvable:$true] %s345_s12 }
  0x25   : > { %3209 = dma.hbm_to_vmem [thread:$0]  (!%p3785_p10), %s312_s1, 1024, %s314_s26, [#allocation6], %s4732_s21, %s4732_s21, %s4731_s30  }
  0x26   : > { %3215 = dma.hbm_to_vmem [thread:$0]  (!%p3785_p10), %s346_s12, 1024, %s348_s25, [#allocation9], %s4732_s21, %s4732_s21, %s4731_s30  }
  0x27   : > { %p3827_p3 = por %p244_p2, %p46_p12  ;;  %p3231_p5 = scmp.lt.s32.totalorder %s3667_s16, 2 }
  0x28   : > { %s3833_s23 = scalar_select %p37_p13, %s3663_s15, %s39_s11  }
  0x29   : > { %p48_p7 = por %p47_p0, %p46_p12  ;;  %s364_s27 = sand.u32 1, %s3663_s15  }
  0x2a   : > { %4734 = sst [smem:[#allocation20_spill]] %s3833_s23  ;;  %s2761_s26 = sshll.u32 %s364_s27, 7 }
  0x2b   : > { %s3104_s12 = sshll.u32 %s3667_s16, 7  ;;  %s368_s3 = scalar_lea.vmem [#allocation2], %s2761_s26 }
  0x2c   : > { %s374_s25 = scalar_lea.hbm %s4702_s0, %s3104_s12  ;;  %s377_s5 = sshll.u32 %s368_s3, 4  ;;  %s378_s5 = int_to_ptr.vmem [resolvable:$true] %s377_s5 }
  0x2d   : > { %s375_s29 = sshll.u32 %s374_s25, 4  ;;  %p3840_p2 = pnand %p3231_p5, %p48_p7  ;;  %s376_s29 = int_to_ptr.hbm [resolvable:$true] %s375_s29 }
  0x2e   : > { %s365_s11 = scalar_lea.sflag [#allocation3], %s364_s27  ;;  %s3531_s23 = sshra.s32 %s376_s29, 4  ;;  %s3532_s23 = int_to_ptr.hbm [resolvable:$true] %s3531_s23 }
  0x2f   : > { %s3533_s15 = scalar_lea.hbm %s3532_s23, 128  ;;  %p3535_p10 = pneg %p3840_p2 }
  0x30   : > { %p3534_p9 = scmp.ne.s32.totalorder %s3532_s23, %s3533_s15  ;;  %s3538_s3 = scalar_lea.hbm %s4702_s0, 256 }
  0x31   : > { %p3539_p0 = scmp.lt.s32.totalorder %s3532_s23, %s4702_s0  ;;  %p3540_p5 = scmp.lt.s32.totalorder %s3538_s3, %s3533_s15 }
  0x32   : > { %p3536_p12 = pnand %p3535_p10, %p3534_p9 }
  0x33   : > { %p3541_p7 = por %p3540_p5, %p3539_p0 }
  0x34   : > { %p3537_p13 = pneg %p3536_p12 }
  0x36   : > { %p3542_p11 = pnand %p3541_p7, %p3537_p13 }
  0x38   : > { %3545 = shalt.err (!%p3542_p11)
}
  0x39   : > { %3219 = dma.hbm_to_vmem [thread:$0]  (!%p3840_p2), %s376_s29, 2048, %s378_s5, %s365_s11, %s4732_s21, %s4732_s21, %s4731_s30  }
  0x3a   : > { %389 = sbr.rel (%p3777_p8) target bundleno = 1808 (0x710), region = 56  ;;  %s3860_s27 = sand.u32 (!%p3777_p8), 1, %s3659_s14  }
  0x3b   : > { %s2766_s23 = sshll.u32 (!%p3777_p8), %s3860_s27, 7  ;;  %s392_s15 = scalar_lea.sflag (!%p3777_p8), [#allocation3], %s3860_s27 }
  0x3c   : > { %s3864_s25 = scalar_lea.vmem (!%p3777_p8), [#allocation2], %s2766_s23 }
  0x3f   : > { %3634 = dma.done.wait (%p3764_p4), %s392_s15, 2048  }
  0x40   : > { %3636 = vsyncadd (%p3764_p4), %s392_s15, 4294965248 }
  0x41   : > { %3638 = dma.done.wait (%p53_p1), [#allocation6], 2048  }
  0x42   : > { %3640 = vsyncadd (%p53_p1), [#allocation6], 4294965248 }
  0x43   : > { %3642 = dma.done.wait (%p53_p1), [#allocation9], 4096  }
  0x44   : > { %3644 = vsyncadd (%p53_p1), [#allocation9], 4294963200  ;;  %v3128_v0 = vld [vmem:[#allocation5 + $0x38] sm:$0xff]  ;;  %v3127_v1 = vld [vmem:[#allocation5 + $0x30] sm:$0xff]  ;;  %s2771_s29 = sshll.u32 %s3860_s27, 8  ;;  %s3178_s23 = sshll.u32 %s3755_s17, 8 }
  0x45   : > { %657 = vmatpush.bf16.msra.mxu0 %v3128_v0  ;;  %v3126_v2 = vld [vmem:[#allocation5 + $0x28] sm:$0xff]  ;;  %v3125_v3 = vld [vmem:[#allocation5 + $0x20] sm:$0xff]  ;;  %v3124_v4 = vld [vmem:[#allocation5 + $0x18] sm:$0xff]  ;;  %s4370_s11 = scalar_lea.vmem [#allocation12], %s2771_s29  ;;  %s4538_s3 = scalar_lea.vmem [#allocation11], %s2771_s29 }
  0x46   : > { %v3123_v5 = vld [vmem:[#allocation5 + $0x10] sm:$0xff]  ;;  %v3122_v6 = vld [vmem:[#allocation5 + $0x8] sm:$0xff]  ;;  %v3121_v7 = vld [vmem:[#allocation5] sm:$0xff]  ;;  %s2606_s5 = scalar_lea.hbm %s4712_s10, %s3178_s23  ;;  %s2607_s7 = sshll.u32 %s4370_s11, 4  ;;  %s2608_s7 = int_to_ptr.vmem [resolvable:$true] %s2607_s7 }
  0x47   : > { %v3105_v8 = vld [vmem:[%s3864_s25] sm:$0xff]  ;;  %v3106_v9 = vld [vmem:[%s3864_s25 + $0x8] sm:$0xff]  ;;  %v3107_v10 = vld [vmem:[%s3864_s25 + $0x10] sm:$0xff]  ;;  %s2609_s19 = sshll.u32 %s2606_s5, 4  ;;  %s2576_s24 = scalar_lea.sflag [#allocation13], %s3860_s27  ;;  %s2610_s19 = int_to_ptr.hbm [resolvable:$true] %s2609_s19 }
  0x48   : > { %v3108_v11 = vld [vmem:[%s3864_s25 + $0x18] sm:$0xff]  ;;  %v3109_v12 = vld [vmem:[%s3864_s25 + $0x20] sm:$0xff]  ;;  %v3110_v14 = vld [vmem:[%s3864_s25 + $0x28] sm:$0xff]  ;;  %s3575_s30 = sshra.s32 %s2610_s19, 4  ;;  %s3581_s26 = scalar_lea.hbm %s4712_s10, 512  ;;  %s3576_s30 = int_to_ptr.hbm [resolvable:$true] %s3575_s30 }
  0x49   : > { %658 = vmatpush.bf16.msra.mxu0 %v3127_v1  ;;  %v3136_v13 = vld [vmem:[#allocation7 + $0x38] sm:$0xff]  ;;  %v3135_v15 = vld [vmem:[#allocation7 + $0x30] sm:$0xff]  ;;  %v3134_v16 = vld [vmem:[#allocation7 + $0x28] sm:$0xff]  ;;  %s3577_s21 = scalar_lea.hbm %s3576_s30, 256  ;;  %p3582_p11 = scmp.lt.s32.totalorder %s3576_s30, %s4712_s10 }
  0x4a   : > { %862 = vmatpush.bf16.msra.mxu1 %v3136_v13  ;;  %v3133_v17 = vld [vmem:[#allocation7 + $0x20] sm:$0xff]  ;;  %v3132_v18 = vld [vmem:[#allocation7 + $0x18] sm:$0xff]  ;;  %v3111_v19 = vld [vmem:[%s3864_s25 + $0x30] sm:$0xff]  ;;  %p3578_p1 = scmp.ne.s32.totalorder %s3576_s30, %s3577_s21  ;;  %p3583_p2 = scmp.lt.s32.totalorder %s3581_s26, %s3577_s21 }
  0x4b   : > { %v3131_v20 = vld [vmem:[#allocation7 + $0x10] sm:$0xff]  ;;  %v3130_v21 = vld [vmem:[#allocation7 + $0x8] sm:$0xff]  ;;  %v3129_v22 = vld [vmem:[#allocation7] sm:$0xff] }
  0x4c   : > { %v3112_v23 = vld [vmem:[%s3864_s25 + $0x38] sm:$0xff]  ;;  %v3113_v24 = vld [vmem:[%s3864_s25 + $0x40] sm:$0xff]  ;;  %v3114_v33 = vld [vmem:[%s3864_s25 + $0x48] sm:$0xff]  ;;  %p3579_p4 = pnand %p3578_p1, %p3827_p3  ;;  %p3584_p9 = por %p3583_p2, %p3582_p11 }
  0x4d   : > { %659 = vmatpush.bf16.msra.mxu0 %v3126_v2  ;;  %v3890_v26 = vld [vmem:[%s4704_s2] ss:$0 sm:$0xff]  ;;  %v3115_v41 = vld [vmem:[%s3864_s25 + $0x50] sm:$0xff]  ;;  %v3116_v49 = vld [vmem:[%s3864_s25 + $0x58] sm:$0xff] }
  0x4e   : > { %863 = vmatpush.bf16.msra.mxu1 %v3135_v15  ;;  %v3117_v57 = vld [vmem:[%s3864_s25 + $0x60] sm:$0xff]  ;;  %v3118_v1 = vld [vmem:[%s3864_s25 + $0x68] sm:$0xff]  ;;  %p3580_p8 = pneg %p3579_p4 }
  0x50   : > { %p3585_p10 = pnand %p3584_p9, %p3580_p8 }
  0x51   : > { %660 = vmatpush.bf16.msra.mxu0 %v3125_v3 }
  0x52   : > { %864 = vmatpush.bf16.msra.mxu1 %v3134_v16 }
  0x55   : > { %661 = vmatpush.bf16.msra.mxu0 %v3124_v4 }
  0x56   : > { %865 = vmatpush.bf16.msra.mxu1 %v3133_v17 }
  0x59   : > { %662 = vmatpush.bf16.msra.mxu0 %v3123_v5 }
  0x5a   : > { %866 = vmatpush.bf16.msra.mxu1 %v3132_v18  ;;  %v3119_v18 = vld [vmem:[%s3864_s25 + $0x70] sm:$0xff] }
  0x5d   : > { %663 = vmatpush.bf16.msra.mxu0 %v3122_v6  ;;  %v2987_v6 = vld [vmem:[#allocation8 + $0xa8] sm:$0xf] }
  0x5e   : > { %867 = vmatpush.bf16.msra.mxu1 %v3131_v20  ;;  %v3156_v20 = vld [vmem:[#allocation8 + $0x98] sm:$0xf0] }
  0x61   : > { %664 = vmatpush.bf16.msra.mxu0 %v3121_v7  ;;  %v3159_v7 = vld [vmem:[#allocation8 + $0xb0] sm:$0xf0] }
  0x62   : > { %868 = vmatpush.bf16.msra.mxu1 %v3130_v21  ;;  %v3155_v21 = vld [vmem:[#allocation8 + $0x94] sm:$0xf] }
  0x64   : > { %665 = vmatmul.bf16.vlgmr.msra.gmra.mxu0 %v3105_v8  ;;  %v3158_v8 = vld [vmem:[#allocation8 + $0xac] sm:$0xf] }
  0x66   : > { %869 = vmatpush.bf16.msra.mxu1 %v3129_v22 }
  0x74   : > { %670 = vmatmul.bf16.gmra.mxu0 %v3106_v9  ;;  %v2988_v9 = vor.u32 %v3159_v7, %v2987_v6  ;;  %v3120_v6 = vld [vmem:[%s3864_s25 + $0x78] sm:$0xff] }
  0x76   : > { %1167 = vmatpush.bf16.msra.mxu2 %v2988_v9 }
  0x84   : > { %675 = vmatmul.bf16.gmra.mxu0 %v3107_v10  ;;  %v2989_v10 = vld [vmem:[#allocation8 + $0xb4] sm:$0xf0] }
  0x85   : > { %v2992_v15 = vor.u32 %v3158_v8, %v2989_v10  ;;  %v2915_v10 = vld [vmem:[#allocation8 + $0x18] sm:$0xf] }
  0x87   : > { %1256 = vmatpush.bf16.msra.mxu3 %v2992_v15  ;;  %v2923_v15 = vld [vmem:[#allocation8 + $0x20] sm:$0xf] }
  0x94   : > { %680 = vmatmul.bf16.gmra.mxu0 %v3108_v11  ;;  %v2995_v11 = vld [vmem:[#allocation8 + $0xb0] sm:$0xf] }
  0xa4   : > { %685 = vmatmul.bf16.gmra.mxu0 %v3109_v12  ;;  %v3160_v12 = vld [vmem:[#allocation8 + $0xb8] sm:$0xf0] }
  0xa5   : > { %v2996_v16 = vor.u32 %v3160_v12, %v2995_v11  ;;  %v3141_v11 = vld [vmem:[#allocation8 + $0x20] sm:$0xf0]  ;;  %v3140_v12 = vld [vmem:[#allocation8 + $0x1c] sm:$0xf] }
  0xa7   : > { %1345 = vmatpush.bf16.msrb.mxu0 %v2996_v16  ;;  %v3142_v16 = vld [vmem:[#allocation8 + $0x28] sm:$0xf0] }
  0xb4   : > { %690 = vmatmul.bf16.gmra.mxu0 %v3110_v14 }
  0xc4   : > { %695 = vmatmul.bf16.gmra.mxu0 %v3111_v19  ;;  %v2975_v19 = vld [vmem:[#allocation8 + $0x90] sm:$0xf] }
  0xc5   : > { %v2976_v22 = vor.u32 %v3156_v20, %v2975_v19  ;;  %v2903_v19 = vld [vmem:[#allocation8] sm:$0xf]  ;;  %v3138_v20 = vld [vmem:[#allocation8 + $0x8] sm:$0xf0] }
  0xc7   : > { %1168 = vmatpush.bf16.msra.mxu2 %v2976_v22  ;;  %v2904_v22 = vor.u32 %v3138_v20, %v2903_v19 }
  0xd4   : > { %700 = vmatmul.bf16.gmra.mxu0 %v3112_v23  ;;  %v2977_v23 = vld [vmem:[#allocation8 + $0x9c] sm:$0xf0] }
  0xe1   : > { %v666_v25 = vpop.f32.mrf.mxu0 }
  0xe2   : > { %v667_v27 = vadd.f32 %v3890_v26, %v666_v25  ;;  %v3157_v25 = vld [vmem:[#allocation8 + $0xa0] sm:$0xf0] }
  0xe4   : > { %705 = vmatmul.bf16.gmra.mxu0 %v3113_v24  ;;  %v746_v30 = vmax.f32 %v667_v27, 0.0  ;;  %v2983_v24 = vld [vmem:[#allocation8 + $0x98] sm:$0xf]  ;;  %v2980_v27 = vor.u32 %v3155_v21, %v2977_v23  ;;  %v3137_v21 = vld [vmem:[#allocation8 + $0x4] sm:$0xf] }
  0xe5   : > { %v2905_v23 = vld [vmem:[#allocation8 + $0xc] sm:$0xf0] }
  0xe6   : > { %1257 = vmatpush.bf16.msra.mxu3 %v2980_v27 }
  0xe9   : > { %v668_v28 = vpop.f32.mrf.mxu0 }
  0xea   : > { %v669_v29 = vadd.f32 %v3890_v26, %v668_v28  ;;  %v2984_v28 = vor.u32 %v3157_v25, %v2983_v24  ;;  %v2911_v24 = vld [vmem:[#allocation8 + $0x8] sm:$0xf]  ;;  %v3139_v25 = vld [vmem:[#allocation8 + $0x10] sm:$0xf0] }
  0xec   : > { %v747_v31 = vmax.f32 %v669_v29, 0.0  ;;  %v2963_v29 = vld [vmem:[#allocation8 + $0x78] sm:$0xf]  ;;  %1346 = vmatpush.bf16.msrb.mxu0 %v2984_v28  ;;  %v2908_v28 = vor.u32 %v3137_v21, %v2905_v23 }
  0xee   : > { %v778_v32 = vpack.c.bf16 %v747_v31, %v746_v30  ;;  %v3153_v30 = vld [vmem:[#allocation8 + $0x80] sm:$0xf0]  ;;  %v3152_v31 = vld [vmem:[#allocation8 + $0x7c] sm:$0xf] }
  0xf0   : > { %870 = vmatmul.bf16.vlgmr.msra.gmra.mxu1 %v778_v32 }
  0xf1   : > { %v671_v34 = vpop.f32.mrf.mxu0 }
  0xf2   : > { %v672_v35 = vadd.f32 %v3890_v26, %v671_v34  ;;  %v2965_v34 = vld [vmem:[#allocation8 + $0x84] sm:$0xf0] }
  0xf4   : > { %710 = vmatmul.bf16.gmra.mxu0 %v3114_v33  ;;  %v748_v38 = vmax.f32 %v672_v35, 0.0  ;;  %v2964_v33 = vor.u32 %v3153_v30, %v2963_v29  ;;  %v2971_v35 = vld [vmem:[#allocation8 + $0x80] sm:$0xf]  ;;  %v2912_v29 = vor.u32 %v3139_v25, %v2911_v24 }
  0xf6   : > { %1169 = vmatpush.bf16.msra.mxu2 %v2964_v33 }
  0xf9   : > { %v673_v36 = vpop.f32.mrf.mxu0 }
  0xfa   : > { %v674_v37 = vadd.f32 %v3890_v26, %v673_v36  ;;  %v3154_v36 = vld [vmem:[#allocation8 + $0x88] sm:$0xf0] }
  0xfc   : > { %v749_v39 = vmax.f32 %v674_v37, 0.0  ;;  %v2968_v37 = vor.u32 %v3152_v31, %v2965_v34 }
  0xfe   : > { %v779_v40 = vpack.c.bf16 %v749_v39, %v748_v38  ;;  %v2972_v38 = vor.u32 %v3154_v36, %v2971_v35  ;;  %v2951_v39 = vld [vmem:[#allocation8 + $0x60] sm:$0xf]  ;;  %1258 = vmatpush.bf16.msra.mxu3 %v2968_v37 }
 0x100   : > { %875 = vmatmul.bf16.gmra.mxu1 %v779_v40  ;;  %v3150_v40 = vld [vmem:[#allocation8 + $0x68] sm:$0xf0]  ;;  %1347 = vmatpush.bf16.msrb.mxu0 %v2972_v38 }
 0x101   : > { %v676_v42 = vpop.f32.mrf.mxu0 }
 0x102   : > { %v677_v43 = vadd.f32 %v3890_v26, %v676_v42  ;;  %v2953_v42 = vld [vmem:[#allocation8 + $0x6c] sm:$0xf0] }
 0x104   : > { %715 = vmatmul.bf16.gmra.mxu0 %v3115_v41  ;;  %v750_v46 = vmax.f32 %v677_v43, 0.0  ;;  %v3149_v41 = vld [vmem:[#allocation8 + $0x64] sm:$0xf]  ;;  %v2959_v43 = vld [vmem:[#allocation8 + $0x68] sm:$0xf] }
 0x109   : > { %v678_v44 = vpop.f32.mrf.mxu0 }
 0x10a   : > { %v679_v45 = vadd.f32 %v3890_v26, %v678_v44  ;;  %v3151_v44 = vld [vmem:[#allocation8 + $0x70] sm:$0xf0] }
 0x10c   : > { %v751_v47 = vmax.f32 %v679_v45, 0.0  ;;  %v2952_v45 = vor.u32 %v3150_v40, %v2951_v39 }
 0x10e   : > { %v780_v48 = vpack.c.bf16 %v751_v47, %v750_v46  ;;  %v2956_v46 = vor.u32 %v3149_v41, %v2953_v42  ;;  %v2960_v47 = vor.u32 %v3151_v44, %v2959_v43  ;;  %1170 = vmatpush.bf16.msra.mxu2 %v2952_v45  ;;  %v3920_v43 = vld [vmem:[%s4706_s4] ss:$0 sm:$0xff] }
 0x110   : > { %880 = vmatmul.bf16.gmra.mxu1 %v780_v48  ;;  %1259 = vmatpush.bf16.msra.mxu3 %v2956_v46 }
 0x111   : > { %v681_v50 = vpop.f32.mrf.mxu0  ;;  %1348 = vmatpush.bf16.msrb.mxu0 %v2960_v47 }
 0x112   : > { %v682_v51 = vadd.f32 %v3890_v26, %v681_v50 }
 0x114   : > { %720 = vmatmul.bf16.gmra.mxu0 %v3116_v49  ;;  %v752_v54 = vmax.f32 %v682_v51, 0.0  ;;  %v2939_v51 = vld [vmem:[#allocation8 + $0x48] sm:$0xf] }
 0x119   : > { %v683_v52 = vpop.f32.mrf.mxu0 }
 0x11a   : > { %v684_v53 = vadd.f32 %v3890_v26, %v683_v52  ;;  %v3147_v52 = vld [vmem:[#allocation8 + $0x50] sm:$0xf0] }
 0x11c   : > { %v753_v55 = vmax.f32 %v684_v53, 0.0  ;;  %v3146_v53 = vld [vmem:[#allocation8 + $0x4c] sm:$0xf] }
 0x11e   : > { %v781_v56 = vpack.c.bf16 %v753_v55, %v752_v54  ;;  %v2940_v54 = vor.u32 %v3147_v52, %v2939_v51  ;;  %v2941_v55 = vld [vmem:[#allocation8 + $0x54] sm:$0xf0] }
 0x120   : > { %885 = vmatmul.bf16.gmra.mxu1 %v781_v56  ;;  %v2947_v56 = vld [vmem:[#allocation8 + $0x50] sm:$0xf]  ;;  %1171 = vmatpush.bf16.msra.mxu2 %v2940_v54 }
 0x121   : > { %v686_v58 = vpop.f32.mrf.mxu0 }
 0x122   : > { %v687_v59 = vadd.f32 %v3890_v26, %v686_v58 }
 0x124   : > { %725 = vmatmul.bf16.gmra.mxu0 %v3117_v57  ;;  %v754_v62 = vmax.f32 %v687_v59, 0.0  ;;  %v3148_v57 = vld [vmem:[#allocation8 + $0x58] sm:$0xf0] }
 0x129   : > { %v688_v60 = vpop.f32.mrf.mxu0 }
 0x12a   : > { %v689_v61 = vadd.f32 %v3890_v26, %v688_v60  ;;  %v2944_v60 = vor.u32 %v3146_v53, %v2941_v55 }
 0x12c   : > { %v755_v63 = vmax.f32 %v689_v61, 0.0  ;;  %v2948_v61 = vor.u32 %v3148_v57, %v2947_v56  ;;  %1260 = vmatpush.bf16.msra.mxu3 %v2944_v60 }
 0x12e   : > { %v782_v0 = vpack.c.bf16 %v755_v63, %v754_v62  ;;  %1349 = vmatpush.bf16.msrb.mxu0 %v2948_v61  ;;  %v2927_v63 = vld [vmem:[#allocation8 + $0x30] sm:$0xf] }
 0x130   : > { %890 = vmatmul.bf16.gmra.mxu1 %v782_v0  ;;  %v3144_v0 = vld [vmem:[#allocation8 + $0x38] sm:$0xf0] }
 0x131   : > { %v691_v2 = vpop.f32.mrf.mxu0 }
 0x132   : > { %v692_v3 = vadd.f32 %v3890_v26, %v691_v2  ;;  %v2928_v2 = vor.u32 %v3144_v0, %v2927_v63 }
 0x134   : > { %730 = vmatmul.bf16.gmra.mxu0 %v3118_v1  ;;  %v756_v13 = vmax.f32 %v692_v3, 0.0  ;;  %v3143_v1 = vld [vmem:[#allocation8 + $0x34] sm:$0xf]  ;;  %v2929_v3 = vld [vmem:[#allocation8 + $0x3c] sm:$0xf0]  ;;  %1172 = vmatpush.bf16.msra.mxu2 %v2928_v2 }
 0x135   : > { %v2932_v7 = vor.u32 %v3143_v1, %v2929_v3 }
 0x137   : > { %1261 = vmatpush.bf16.msra.mxu3 %v2932_v7 }
 0x139   : > { %v693_v4 = vpop.f32.mrf.mxu0 }
 0x13a   : > { %v694_v5 = vadd.f32 %v3890_v26, %v693_v4  ;;  %v2935_v4 = vld [vmem:[#allocation8 + $0x38] sm:$0xf] }
 0x13c   : > { %v757_v14 = vmax.f32 %v694_v5, 0.0  ;;  %v3145_v5 = vld [vmem:[#allocation8 + $0x40] sm:$0xf0] }
 0x13d   : > { %v2936_v8 = vor.u32 %v3145_v5, %v2935_v4 }
 0x13e   : > { %v783_v17 = vpack.c.bf16 %v757_v14, %v756_v13  ;;  %v2916_v13 = vor.u32 %v3141_v11, %v2915_v10  ;;  %v2917_v14 = vld [vmem:[#allocation8 + $0x24] sm:$0xf0] }
 0x13f   : > { %1350 = vmatpush.bf16.msrb.mxu0 %v2936_v8 }
 0x140   : > { %895 = vmatmul.bf16.gmra.mxu1 %v783_v17  ;;  %v2920_v17 = vor.u32 %v3140_v12, %v2917_v14  ;;  %1173 = vmatpush.bf16.msra.mxu2 %v2916_v13 }
 0x141   : > { %v696_v32 = vpop.f32.mrf.mxu0 }
 0x142   : > { %v697_v48 = vadd.f32 %v3890_v26, %v696_v32  ;;  %1262 = vmatpush.bf16.msra.mxu3 %v2920_v17 }
 0x144   : > { %735 = vmatmul.bf16.gmra.mxu0 %v3119_v18  ;;  %v758_v58 = vmax.f32 %v697_v48, 0.0  ;;  %v2924_v18 = vor.u32 %v3142_v16, %v2923_v15  ;;  %1174 = vmatpush.bf16.msra.mxu2 %v2904_v22 }
 0x146   : > { %1351 = vmatpush.bf16.msrb.mxu0 %v2924_v18  ;;  %1263 = vmatpush.bf16.msra.mxu3 %v2908_v28 }
 0x149   : > { %v698_v49 = vpop.f32.mrf.mxu0 }
 0x14a   : > { %v699_v50 = vadd.f32 %v3890_v26, %v698_v49  ;;  %1352 = vmatpush.bf16.msrb.mxu0 %v2912_v29 }
 0x14c   : > { %v759_v59 = vmax.f32 %v699_v50, 0.0 }
 0x14e   : > { %v784_v62 = vpack.c.bf16 %v759_v59, %v758_v58 }
 0x150   : > { %900 = vmatmul.bf16.gmra.mxu1 %v784_v62 }
 0x151   : > { %v701_v9 = vpop.f32.mrf.mxu0 }
 0x152   : > { %v702_v27 = vadd.f32 %v3890_v26, %v701_v9 }
 0x154   : > { %740 = vmatmul.bf16.gmra.mxu0 %v3120_v6  ;;  %v760_v32 = vmax.f32 %v702_v27, 0.0 }
 0x159   : > { %v703_v30 = vpop.f32.mrf.mxu0 }
 0x15a   : > { %v704_v31 = vadd.f32 %v3890_v26, %v703_v30 }
 0x15c   : > { %v761_v33 = vmax.f32 %v704_v31, 0.0 }
 0x15e   : > { %v785_v34 = vpack.c.bf16 %v761_v33, %v760_v32 }
 0x160   : > { %905 = vmatmul.bf16.gmra.mxu1 %v785_v34 }
 0x161   : > { %v706_v35 = vpop.f32.mrf.mxu0 }
 0x162   : > { %v707_v36 = vadd.f32 %v3890_v26, %v706_v35 }
 0x164   : > { %v762_v38 = vmax.f32 %v707_v36, 0.0 }
 0x169   : > { %v708_v37 = vpop.f32.mrf.mxu0 }
 0x16a   : > { %v709_v39 = vadd.f32 %v3890_v26, %v708_v37 }
 0x16c   : > { %v763_v40 = vmax.f32 %v709_v39, 0.0 }
 0x16d   : > { %v871_v41 = vpop.f32.mrf.mxu1 }
 0x16e   : > { %v786_v42 = vpack.c.bf16 %v763_v40, %v762_v38  ;;  %v872_v45 = vadd.f32 %v3920_v43, %v871_v41 }
 0x170   : > { %910 = vmatmul.bf16.gmra.mxu1 %v786_v42  ;;  %v951_v49 = vmax.f32 %v872_v45, 0.0 }
 0x171   : > { %v711_v44 = vpop.f32.mrf.mxu0 }
 0x172   : > { %v712_v48 = vadd.f32 %v3890_v26, %v711_v44 }
 0x174   : > { %v764_v53 = vmax.f32 %v712_v48, 0.0 }
 0x175   : > { %v873_v46 = vpop.f32.mrf.mxu1 }
 0x176   : > { %v874_v47 = vadd.f32 %v3920_v43, %v873_v46 }
 0x178   : > { %v952_v50 = vmax.f32 %v874_v47, 0.0 }
 0x179   : > { %v713_v51 = vpop.f32.mrf.mxu0 }
 0x17a   : > { %v983_v52 = vpack.c.bf16 %v952_v50, %v951_v49  ;;  %v714_v54 = vadd.f32 %v3890_v26, %v713_v51 }
 0x17c   : > { %1175 = vmatmul.bf16.vlgmr.msra.gmra.mxu2 %v983_v52  ;;  %1264 = vmatmul.bf16.vlgmr.msra.gmra.mxu3 %v983_v52  ;;  %v765_v55 = vmax.f32 %v714_v54, 0.0 }
 0x17d   : > { %1353 = vmatmul.bf16.vlgmr.msrb.gmra.mxu0 %v983_v52  ;;  %v876_v56 = vpop.f32.mrf.mxu1 }
 0x17e   : > { %v787_v57 = vpack.c.bf16 %v765_v55, %v764_v53  ;;  %v877_v59 = vadd.f32 %v3920_v43, %v876_v56 }
 0x180   : > { %915 = vmatmul.bf16.gmra.mxu1 %v787_v57  ;;  %v953_v63 = vmax.f32 %v877_v59, 0.0 }
 0x181   : > { %v716_v58 = vpop.f32.mrf.mxu0 }
 0x182   : > { %v717_v62 = vadd.f32 %v3890_v26, %v716_v58 }
 0x184   : > { %v766_v3 = vmax.f32 %v717_v62, 0.0 }
 0x185   : > { %v878_v60 = vpop.f32.mrf.mxu1 }
 0x186   : > { %v879_v61 = vadd.f32 %v3920_v43, %v878_v60 }
 0x188   : > { %v954_v0 = vmax.f32 %v879_v61, 0.0 }
 0x189   : > { %v718_v1 = vpop.f32.mrf.mxu0 }
 0x18a   : > { %v984_v2 = vpack.c.bf16 %v954_v0, %v953_v63  ;;  %v719_v4 = vadd.f32 %v3890_v26, %v718_v1 }
 0x18c   : > { %1180 = vmatmul.bf16.gmra.mxu2 %v984_v2  ;;  %1269 = vmatmul.bf16.gmra.mxu3 %v984_v2  ;;  %v767_v5 = vmax.f32 %v719_v4, 0.0 }
 0x18d   : > { %1358 = vmatmul.bf16.gmra.mxu0 %v984_v2  ;;  %v881_v6 = vpop.f32.mrf.mxu1 }
 0x18e   : > { %v788_v7 = vpack.c.bf16 %v767_v5, %v766_v3  ;;  %v882_v9 = vadd.f32 %v3920_v43, %v881_v6 }
 0x190   : > { %920 = vmatmul.bf16.gmra.mxu1 %v788_v7  ;;  %v955_v13 = vmax.f32 %v882_v9, 0.0 }
 0x191   : > { %v721_v8 = vpop.f32.mrf.mxu0 }
 0x192   : > { %v722_v12 = vadd.f32 %v3890_v26, %v721_v8 }
 0x194   : > { %v768_v17 = vmax.f32 %v722_v12, 0.0 }
 0x195   : > { %v883_v10 = vpop.f32.mrf.mxu1 }
 0x196   : > { %v884_v11 = vadd.f32 %v3920_v43, %v883_v10 }
 0x198   : > { %v956_v14 = vmax.f32 %v884_v11, 0.0 }
 0x199   : > { %v723_v15 = vpop.f32.mrf.mxu0 }
 0x19a   : > { %v985_v16 = vpack.c.bf16 %v956_v14, %v955_v13  ;;  %v724_v18 = vadd.f32 %v3890_v26, %v723_v15 }
 0x19c   : > { %1185 = vmatmul.bf16.gmra.mxu2 %v985_v16  ;;  %1274 = vmatmul.bf16.gmra.mxu3 %v985_v16  ;;  %v769_v19 = vmax.f32 %v724_v18, 0.0 }
 0x19d   : > { %1363 = vmatmul.bf16.gmra.mxu0 %v985_v16  ;;  %v886_v20 = vpop.f32.mrf.mxu1 }
 0x19e   : > { %v789_v21 = vpack.c.bf16 %v769_v19, %v768_v17  ;;  %v887_v23 = vadd.f32 %v3920_v43, %v886_v20 }
 0x1a0   : > { %925 = vmatmul.bf16.gmra.mxu1 %v789_v21  ;;  %v957_v28 = vmax.f32 %v887_v23, 0.0 }
 0x1a1   : > { %v726_v22 = vpop.f32.mrf.mxu0 }
 0x1a2   : > { %v727_v27 = vadd.f32 %v3890_v26, %v726_v22 }
 0x1a4   : > { %v770_v32 = vmax.f32 %v727_v27, 0.0  ;;  %v1031_v27 = vld [vmem:[%s4708_s6] sm:$0x7] }
 0x1a5   : > { %v888_v24 = vpop.f32.mrf.mxu1 }
 0x1a6   : > { %v889_v25 = vadd.f32 %v3920_v43, %v888_v24 }
 0x1a8   : > { %v958_v29 = vmax.f32 %v889_v25, 0.0 }
 0x1a9   : > { %v728_v30 = vpop.f32.mrf.mxu0 }
 0x1aa   : > { %v986_v31 = vpack.c.bf16 %v958_v29, %v957_v28  ;;  %v729_v33 = vadd.f32 %v3890_v26, %v728_v30 }
 0x1ac   : > { %1190 = vmatmul.bf16.gmra.mxu2 %v986_v31  ;;  %1279 = vmatmul.bf16.gmra.mxu3 %v986_v31  ;;  %v771_v34 = vmax.f32 %v729_v33, 0.0  ;;  %v3961_v33 = vperm.slane %v1031_v27, 1 }
 0x1ad   : > { %1368 = vmatmul.bf16.gmra.mxu0 %v986_v31  ;;  %v891_v35 = vpop.f32.mrf.mxu1  ;;  %v3957_v31 = vperm.slane %v1031_v27, 2 }
 0x1ae   : > { %v790_v36 = vpack.c.bf16 %v771_v34, %v770_v32  ;;  %v892_v38 = vadd.f32 %v3920_v43, %v891_v35  ;;  %v3959_v32 = vperm.slane %v1031_v27, 0 }
 0x1b0   : > { %930 = vmatmul.bf16.gmra.mxu1 %v790_v36  ;;  %v959_v42 = vmax.f32 %v892_v38, 0.0 }
 0x1b1   : > { %v731_v37 = vpop.f32.mrf.mxu0 }
 0x1b2   : > { %v732_v41 = vadd.f32 %v3890_v26, %v731_v37 }
 0x1b4   : > { %v772_v47 = vmax.f32 %v732_v41, 0.0 }
 0x1b5   : > { %v893_v39 = vpop.f32.mrf.mxu1 }
 0x1b6   : > { %v894_v40 = vadd.f32 %v3920_v43, %v893_v39 }
 0x1b8   : > { %v960_v44 = vmax.f32 %v894_v40, 0.0 }
 0x1b9   : > { %v733_v45 = vpop.f32.mrf.mxu0 }
 0x1ba   : > { %v987_v46 = vpack.c.bf16 %v960_v44, %v959_v42  ;;  %v734_v48 = vadd.f32 %v3890_v26, %v733_v45 }
 0x1bc   : > { %1195 = vmatmul.bf16.gmra.mxu2 %v987_v46  ;;  %1284 = vmatmul.bf16.gmra.mxu3 %v987_v46  ;;  %v773_v49 = vmax.f32 %v734_v48, 0.0 }
 0x1bd   : > { %1373 = vmatmul.bf16.gmra.mxu0 %v987_v46  ;;  %v896_v50 = vpop.f32.mrf.mxu1 }
 0x1be   : > { %v791_v51 = vpack.c.bf16 %v773_v49, %v772_v47  ;;  %v897_v53 = vadd.f32 %v3920_v43, %v896_v50 }
 0x1c0   : > { %935 = vmatmul.bf16.gmra.mxu1 %v791_v51  ;;  %v961_v57 = vmax.f32 %v897_v53, 0.0 }
 0x1c1   : > { %v736_v52 = vpop.f32.mrf.mxu0 }
 0x1c2   : > { %v737_v56 = vadd.f32 %v3890_v26, %v736_v52 }
 0x1c4   : > { %v774_v61 = vmax.f32 %v737_v56, 0.0 }
 0x1c5   : > { %v898_v54 = vpop.f32.mrf.mxu1 }
 0x1c6   : > { %v899_v55 = vadd.f32 %v3920_v43, %v898_v54 }
 0x1c8   : > { %v962_v58 = vmax.f32 %v899_v55, 0.0 }
 0x1c9   : > { %v738_v59 = vpop.f32.mrf.mxu0 }
 0x1ca   : > { %v988_v60 = vpack.c.bf16 %v962_v58, %v961_v57  ;;  %v739_v62 = vadd.f32 %v3890_v26, %v738_v59 }
 0x1cc   : > { %1200 = vmatmul.bf16.gmra.mxu2 %v988_v60  ;;  %1289 = vmatmul.bf16.gmra.mxu3 %v988_v60  ;;  %v775_v63 = vmax.f32 %v739_v62, 0.0 }
 0x1cd   : > { %1378 = vmatmul.bf16.gmra.mxu0 %v988_v60  ;;  %v901_v0 = vpop.f32.mrf.mxu1 }
 0x1ce   : > { %v792_v1 = vpack.c.bf16 %v775_v63, %v774_v61  ;;  %v902_v3 = vadd.f32 %v3920_v43, %v901_v0 }
 0x1d0   : > { %940 = vmatmul.bf16.gmra.mxu1 %v792_v1  ;;  %v963_v7 = vmax.f32 %v902_v3, 0.0 }
 0x1d1   : > { %v741_v2 = vpop.f32.mrf.mxu0 }
 0x1d2   : > { %v742_v6 = vadd.f32 %v3890_v26, %v741_v2 }
 0x1d4   : > { %v776_v11 = vmax.f32 %v742_v6, 0.0 }
 0x1d5   : > { %v903_v4 = vpop.f32.mrf.mxu1 }
 0x1d6   : > { %v904_v5 = vadd.f32 %v3920_v43, %v903_v4 }
 0x1d8   : > { %v964_v8 = vmax.f32 %v904_v5, 0.0 }
 0x1d9   : > { %v743_v9 = vpop.f32.mrf.mxu0 }
 0x1da   : > { %v989_v10 = vpack.c.bf16 %v964_v8, %v963_v7  ;;  %v744_v12 = vadd.f32 %v3890_v26, %v743_v9 }
 0x1dc   : > { %1205 = vmatmul.bf16.gmra.mxu2 %v989_v10  ;;  %1294 = vmatmul.bf16.gmra.mxu3 %v989_v10  ;;  %v777_v13 = vmax.f32 %v744_v12, 0.0 }
 0x1dd   : > { %1383 = vmatmul.bf16.gmra.mxu0 %v989_v10  ;;  %v906_v14 = vpop.f32.mrf.mxu1 }
 0x1de   : > { %v793_v15 = vpack.c.bf16 %v777_v13, %v776_v11  ;;  %v907_v16 = vadd.f32 %v3920_v43, %v906_v14 }
 0x1e0   : > { %945 = vmatmul.bf16.gmra.mxu1 %v793_v15  ;;  %v965_v19 = vmax.f32 %v907_v16, 0.0 }
 0x1e5   : > { %v908_v17 = vpop.f32.mrf.mxu1 }
 0x1e6   : > { %v909_v18 = vadd.f32 %v3920_v43, %v908_v17 }
 0x1e8   : > { %v966_v20 = vmax.f32 %v909_v18, 0.0 }
 0x1ea   : > { %v990_v21 = vpack.c.bf16 %v966_v20, %v965_v19 }
 0x1ec   : > { %1210 = vmatmul.bf16.gmra.mxu2 %v990_v21  ;;  %1299 = vmatmul.bf16.gmra.mxu3 %v990_v21 }
 0x1ed   : > { %1388 = vmatmul.bf16.gmra.mxu0 %v990_v21  ;;  %v911_v22 = vpop.f32.mrf.mxu1 }
 0x1ee   : > { %v912_v26 = vadd.f32 %v3920_v43, %v911_v22 }
 0x1f0   : > { %v967_v24 = vmax.f32 %v912_v26, 0.0 }
 0x1f5   : > { %v913_v23 = vpop.f32.mrf.mxu1 }
 0x1f6   : > { %v914_v25 = vadd.f32 %v3920_v43, %v913_v23 }
 0x1f8   : > { %v968_v28 = vmax.f32 %v914_v25, 0.0 }
 0x1fa   : > { %v1354_v29 = vpop.f32.mrf.mxu0  ;;  %v991_v30 = vpack.c.bf16 %v968_v28, %v967_v24 }
 0x1fb   : > { %v1355_v35 = vadd.f32 %v1354_v29, %v3957_v31 }
 0x1fc   : > { %1215 = vmatmul.bf16.gmra.mxu2 %v991_v30  ;;  %1304 = vmatmul.bf16.gmra.mxu3 %v991_v30 }
 0x1fd   : > { %v916_v34 = vpop.f32.mrf.mxu1  ;;  %1393 = vmatmul.bf16.gmra.mxu0 %v991_v30  ;;  %v1435_v44 = vpack.c.bf16 %v1355_v35, %v1355_v35 }
 0x1fe   : > { %v917_v42 = vadd.f32 %v3920_v43, %v916_v34 }
 0x1ff   : > { %v1176_v36 = vpop.f32.mrf.mxu2  ;;  %v1265_v37 = vpop.f32.mrf.mxu3  ;;  %v3969_v50 = vunpack.c.l.b16 %v1435_v44 }
 0x200   : > { %v1177_v38 = vadd.f32 %v1176_v36, %v3959_v32  ;;  %v1266_v39 = vadd.f32 %v1265_v37, %v3961_v33  ;;  %v969_v48 = vmax.f32 %v917_v42, 0.0 }
 0x202   : > { %v1434_v40 = vpack.c.bf16 %v1266_v39, %v1177_v38  ;;  %v1356_v41 = vpop.f32.mrf.mxu0 }
 0x203   : > { %v1357_v45 = vadd.f32 %v1356_v41, %v3957_v31 }
 0x204   : > { %v1514_v61 = vunpack.c.l.b16 %v1434_v40  ;;  %v1546_v63 = vunpack.c.h.b16 %v1434_v40 }
 0x205   : > { %v1437_v46 = vpack.c.bf16 %v1357_v45, %v1357_v45  ;;  %v918_v47 = vpop.f32.mrf.mxu1 }
 0x206   : > { %v919_v49 = vadd.f32 %v3920_v43, %v918_v47 }
 0x207   : > { %v3971_v51 = vunpack.c.l.b16 %v1437_v46  ;;  %v1178_v52 = vpop.f32.mrf.mxu2  ;;  %v1267_v53 = vpop.f32.mrf.mxu3 }
 0x208   : > { %v1179_v54 = vadd.f32 %v1178_v52, %v3959_v32  ;;  %v1268_v55 = vadd.f32 %v1267_v53, %v3961_v33  ;;  %v970_v56 = vmax.f32 %v919_v49, 0.0 }
 0x209   : > { %v1827_v57 = vpack.c.b16 %v3971_v51, %v3969_v50 }
 0x20a   : > { %v1436_v58 = vpack.c.bf16 %v1268_v55, %v1179_v54  ;;  %v1359_v59 = vpop.f32.mrf.mxu0  ;;  %v992_v60 = vpack.c.bf16 %v970_v56, %v969_v48 }
 0x20b   : > { %v1360_v4 = vadd.f32 %v1359_v59, %v3957_v31 }
 0x20c   : > { %v1515_v62 = vunpack.c.l.b16 %v1436_v58  ;;  %1220 = vmatmul.bf16.gmra.mxu2 %v992_v60  ;;  %1309 = vmatmul.bf16.gmra.mxu3 %v992_v60  ;;  %v1547_v0 = vunpack.c.h.b16 %v1436_v58 }
 0x20d   : > { %v921_v1 = vpop.f32.mrf.mxu1  ;;  %1398 = vmatmul.bf16.gmra.mxu0 %v992_v60  ;;  %v1439_v12 = vpack.c.bf16 %v1360_v4, %v1360_v4 }
 0x20e   : > { %v3977_v2 = vpack.c.b16 %v1547_v0, %v1546_v63  ;;  %v3979_v3 = vpack.c.b16 %v1515_v62, %v1514_v61  ;;  %v922_v11 = vadd.f32 %v3920_v43, %v921_v1 }
 0x20f   : > { %v1181_v5 = vpop.f32.mrf.mxu2  ;;  %v1270_v6 = vpop.f32.mrf.mxu3  ;;  %v3987_v18 = vunpack.c.l.b16 %v1439_v12 }
 0x210   : > { %v1182_v7 = vadd.f32 %v1181_v5, %v3959_v32  ;;  %v1271_v8 = vadd.f32 %v1270_v6, %v3961_v33  ;;  %v971_v16 = vmax.f32 %v922_v11, 0.0 }
 0x212   : > { %v1438_v9 = vpack.c.bf16 %v1271_v8, %v1182_v7  ;;  %v1361_v10 = vpop.f32.mrf.mxu0 }
 0x213   : > { %v1362_v13 = vadd.f32 %v1361_v10, %v3957_v31 }
 0x214   : > { %v1516_v29 = vunpack.c.l.b16 %v1438_v9  ;;  %v1548_v34 = vunpack.c.h.b16 %v1438_v9 }
 0x215   : > { %v1441_v14 = vpack.c.bf16 %v1362_v13, %v1362_v13  ;;  %v923_v15 = vpop.f32.mrf.mxu1 }
 0x216   : > { %v924_v17 = vadd.f32 %v3920_v43, %v923_v15 }
 0x217   : > { %v3989_v19 = vunpack.c.l.b16 %v1441_v14  ;;  %v1183_v20 = vpop.f32.mrf.mxu2  ;;  %v1272_v21 = vpop.f32.mrf.mxu3 }
 0x218   : > { %v1184_v22 = vadd.f32 %v1183_v20, %v3959_v32  ;;  %v1273_v26 = vadd.f32 %v1272_v21, %v3961_v33  ;;  %v972_v23 = vmax.f32 %v924_v17, 0.0 }
 0x219   : > { %v1828_v24 = vpack.c.b16 %v3989_v19, %v3987_v18 }
 0x21a   : > { %v1440_v25 = vpack.c.bf16 %v1273_v26, %v1184_v22  ;;  %v1364_v27 = vpop.f32.mrf.mxu0  ;;  %v993_v28 = vpack.c.bf16 %v972_v23, %v971_v16 }
 0x21b   : > { %v1365_v39 = vadd.f32 %v1364_v27, %v3957_v31 }
 0x21c   : > { %v1517_v30 = vunpack.c.l.b16 %v1440_v25  ;;  %1225 = vmatmul.bf16.gmra.mxu2 %v993_v28  ;;  %1314 = vmatmul.bf16.gmra.mxu3 %v993_v28  ;;  %v1549_v35 = vunpack.c.h.b16 %v1440_v25 }
 0x21d   : > { %v926_v36 = vpop.f32.mrf.mxu1  ;;  %1403 = vmatmul.bf16.gmra.mxu0 %v993_v28  ;;  %v1443_v48 = vpack.c.bf16 %v1365_v39, %v1365_v39 }
 0x21e   : > { %v3995_v37 = vpack.c.b16 %v1549_v35, %v1548_v34  ;;  %v3997_v38 = vpack.c.b16 %v1517_v30, %v1516_v29  ;;  %v927_v47 = vadd.f32 %v3920_v43, %v926_v36 }
 0x21f   : > { %v1186_v40 = vpop.f32.mrf.mxu2  ;;  %v1275_v41 = vpop.f32.mrf.mxu3  ;;  %v4005_v56 = vunpack.c.l.b16 %v1443_v48 }
 0x220   : > { %v1187_v42 = vadd.f32 %v1186_v40, %v3959_v32  ;;  %v1276_v44 = vadd.f32 %v1275_v41, %v3961_v33  ;;  %v973_v54 = vmax.f32 %v927_v47, 0.0 }
 0x222   : > { %v1442_v45 = vpack.c.bf16 %v1276_v44, %v1187_v42  ;;  %v1366_v46 = vpop.f32.mrf.mxu0 }
 0x223   : > { %v1367_v49 = vadd.f32 %v1366_v46, %v3957_v31 }
 0x224   : > { %v1518_v6 = vunpack.c.l.b16 %v1442_v45  ;;  %v1550_v8 = vunpack.c.h.b16 %v1442_v45 }
 0x225   : > { %v1445_v52 = vpack.c.bf16 %v1367_v49, %v1367_v49  ;;  %v928_v53 = vpop.f32.mrf.mxu1 }
 0x226   : > { %v929_v55 = vadd.f32 %v3920_v43, %v928_v53 }
 0x227   : > { %v4007_v58 = vunpack.c.l.b16 %v1445_v52  ;;  %v1188_v59 = vpop.f32.mrf.mxu2  ;;  %v1277_v60 = vpop.f32.mrf.mxu3 }
 0x228   : > { %v1189_v61 = vadd.f32 %v1188_v59, %v3959_v32  ;;  %v1278_v62 = vadd.f32 %v1277_v60, %v3961_v33  ;;  %v974_v63 = vmax.f32 %v929_v55, 0.0 }
 0x229   : > { %v1829_v0 = vpack.c.b16 %v4007_v58, %v4005_v56 }
 0x22a   : > { %v1444_v1 = vpack.c.bf16 %v1278_v62, %v1189_v61  ;;  %v1369_v4 = vpop.f32.mrf.mxu0  ;;  %v994_v5 = vpack.c.bf16 %v974_v63, %v973_v54 }
 0x22b   : > { %v1370_v13 = vadd.f32 %v1369_v4, %v3957_v31 }
 0x22c   : > { %v1519_v7 = vunpack.c.l.b16 %v1444_v1  ;;  %1230 = vmatmul.bf16.gmra.mxu2 %v994_v5  ;;  %1319 = vmatmul.bf16.gmra.mxu3 %v994_v5  ;;  %v1551_v9 = vunpack.c.h.b16 %v1444_v1 }
 0x22d   : > { %v931_v10 = vpop.f32.mrf.mxu1  ;;  %1408 = vmatmul.bf16.gmra.mxu0 %v994_v5  ;;  %v1447_v26 = vpack.c.bf16 %v1370_v13, %v1370_v13 }
 0x22e   : > { %v4013_v11 = vpack.c.b16 %v1551_v9, %v1550_v8  ;;  %v4015_v12 = vpack.c.b16 %v1519_v7, %v1518_v6  ;;  %v932_v22 = vadd.f32 %v3920_v43, %v931_v10 }
 0x22f   : > { %v1191_v14 = vpop.f32.mrf.mxu2  ;;  %v1280_v15 = vpop.f32.mrf.mxu3  ;;  %v4023_v30 = vunpack.c.l.b16 %v1447_v26 }
 0x230   : > { %v1192_v16 = vadd.f32 %v1191_v14, %v3959_v32  ;;  %v1281_v17 = vadd.f32 %v1280_v15, %v3961_v33  ;;  %v975_v28 = vmax.f32 %v932_v22, 0.0 }
 0x232   : > { %v1446_v20 = vpack.c.bf16 %v1281_v17, %v1192_v16  ;;  %v1371_v21 = vpop.f32.mrf.mxu0 }
 0x233   : > { %v1372_v23 = vadd.f32 %v1371_v21, %v3957_v31 }
 0x234   : > { %v1520_v47 = vunpack.c.l.b16 %v1446_v20  ;;  %v1552_v49 = vunpack.c.h.b16 %v1446_v20 }
 0x235   : > { %v1449_v25 = vpack.c.bf16 %v1372_v23, %v1372_v23  ;;  %v933_v27 = vpop.f32.mrf.mxu1 }
 0x236   : > { %v934_v29 = vadd.f32 %v3920_v43, %v933_v27 }
 0x237   : > { %v4025_v34 = vunpack.c.l.b16 %v1449_v25  ;;  %v1193_v35 = vpop.f32.mrf.mxu2  ;;  %v1282_v36 = vpop.f32.mrf.mxu3 }
 0x238   : > { %v1194_v39 = vadd.f32 %v1193_v35, %v3959_v32  ;;  %v1283_v40 = vadd.f32 %v1282_v36, %v3961_v33  ;;  %v976_v41 = vmax.f32 %v934_v29, 0.0 }
 0x239   : > { %v1830_v42 = vpack.c.b16 %v4025_v34, %v4023_v30 }
 0x23a   : > { %v1448_v44 = vpack.c.bf16 %v1283_v40, %v1194_v39  ;;  %v4031_v45 = vpop.f32.mrf.mxu0  ;;  %v995_v46 = vpack.c.bf16 %v976_v41, %v975_v28 }
 0x23c   : > { %v1521_v48 = vunpack.c.l.b16 %v1448_v44  ;;  %1235 = vmatmul.bf16.gmra.mxu2 %v995_v46  ;;  %1324 = vmatmul.bf16.gmra.mxu3 %v995_v46  ;;  %v1553_v52 = vunpack.c.h.b16 %v1448_v44 }
 0x23d   : > { %v936_v53 = vpop.f32.mrf.mxu1  ;;  %1413 = vmatmul.bf16.gmra.mxu0 %v995_v46 }
 0x23e   : > { %v4033_v54 = vpack.c.b16 %v1553_v52, %v1552_v49  ;;  %v4035_v55 = vpack.c.b16 %v1521_v48, %v1520_v47  ;;  %v937_v4 = vadd.f32 %v3920_v43, %v936_v53 }
 0x23f   : > { %v1196_v59 = vpop.f32.mrf.mxu2  ;;  %v1285_v60 = vpop.f32.mrf.mxu3 }
 0x240   : > { %v1197_v61 = vadd.f32 %v1196_v59, %v3959_v32  ;;  %v1286_v62 = vadd.f32 %v1285_v60, %v3961_v33  ;;  %v977_v6 = vmax.f32 %v937_v4, 0.0 }
 0x242   : > { %v4039_v63 = vpack.c.bf16 %v1286_v62, %v1197_v61  ;;  %v4041_v1 = vpop.f32.mrf.mxu0 }
 0x244   : > { %v1522_v20 = vunpack.c.l.b16 %v4039_v63  ;;  %v1554_v30 = vunpack.c.h.b16 %v4039_v63 }
 0x245   : > { %v938_v5 = vpop.f32.mrf.mxu1 }
 0x246   : > { %v939_v7 = vadd.f32 %v3920_v43, %v938_v5 }
 0x247   : > { %v1198_v8 = vpop.f32.mrf.mxu2  ;;  %v1287_v9 = vpop.f32.mrf.mxu3 }
 0x248   : > { %v1199_v10 = vadd.f32 %v1198_v8, %v3959_v32  ;;  %v1288_v13 = vadd.f32 %v1287_v9, %v3961_v33  ;;  %v978_v14 = vmax.f32 %v939_v7, 0.0 }
 0x24a   : > { %v4047_v15 = vpack.c.bf16 %v1288_v13, %v1199_v10  ;;  %v4049_v16 = vpop.f32.mrf.mxu0  ;;  %v996_v17 = vpack.c.bf16 %v978_v14, %v977_v6 }
 0x24c   : > { %v1523_v21 = vunpack.c.l.b16 %v4047_v15  ;;  %1240 = vmatmul.bf16.gmra.mxu2 %v996_v17  ;;  %1329 = vmatmul.bf16.gmra.mxu3 %v996_v17 }
 0x24d   : > { %v941_v22 = vpop.f32.mrf.mxu1  ;;  %1418 = vmatmul.bf16.gmra.mxu0 %v996_v17 }
 0x24e   : > { %v4053_v26 = vpack.c.b16 %v1523_v21, %v1522_v20  ;;  %v942_v28 = vadd.f32 %v3920_v43, %v941_v22 }
 0x24f   : > { %v1201_v23 = vpop.f32.mrf.mxu2  ;;  %v1290_v25 = vpop.f32.mrf.mxu3 }
 0x250   : > { %v1202_v29 = vadd.f32 %v1201_v23, %v3959_v32  ;;  %v1291_v35 = vadd.f32 %v1290_v25, %v3961_v33  ;;  %v979_v39 = vmax.f32 %v942_v28, 0.0 }
 0x252   : > { %v1381_v27 = vpop.f32.mrf.mxu0  ;;  %v4059_v46 = vpack.c.bf16 %v1291_v35, %v1202_v29 }
 0x254   : > { %v1524_v60 = vunpack.c.l.b16 %v4059_v46 }
 0x255   : > { %v943_v36 = vpop.f32.mrf.mxu1 }
 0x256   : > { %v944_v40 = vadd.f32 %v3920_v43, %v943_v36 }
 0x257   : > { %v1203_v41 = vpop.f32.mrf.mxu2  ;;  %v1292_v44 = vpop.f32.mrf.mxu3 }
 0x258   : > { %v1204_v47 = vadd.f32 %v1203_v41, %v3959_v32  ;;  %v1293_v48 = vadd.f32 %v1292_v44, %v3961_v33  ;;  %v980_v49 = vmax.f32 %v944_v40, 0.0 }
 0x25a   : > { %v4063_v52 = vpack.c.bf16 %v1293_v48, %v1204_v47  ;;  %v1384_v53 = vpop.f32.mrf.mxu0  ;;  %v997_v59 = vpack.c.bf16 %v980_v49, %v979_v39 }
 0x25c   : > { %v1525_v61 = vunpack.c.l.b16 %v4063_v52  ;;  %1245 = vmatmul.bf16.gmra.mxu2 %v997_v59  ;;  %1334 = vmatmul.bf16.gmra.mxu3 %v997_v59 }
 0x25d   : > { %v946_v62 = vpop.f32.mrf.mxu1  ;;  %1423 = vmatmul.bf16.gmra.mxu0 %v997_v59  ;;  %v1385_v59 = vadd.f32 %v1384_v53, %v3957_v31 }
 0x25e   : > { %v4067_v4 = vpack.c.b16 %v1525_v61, %v1524_v60  ;;  %v947_v8 = vadd.f32 %v3920_v43, %v946_v62 }
 0x25f   : > { %v1206_v5 = vpop.f32.mrf.mxu2  ;;  %v1295_v6 = vpop.f32.mrf.mxu3 }
 0x260   : > { %v1207_v9 = vadd.f32 %v1206_v5, %v3959_v32  ;;  %v1296_v10 = vadd.f32 %v1295_v6, %v3961_v33  ;;  %v981_v14 = vmax.f32 %v947_v8, 0.0  ;;  %v1382_v6 = vadd.f32 %v1381_v27, %v3957_v31 }
 0x262   : > { %v1386_v7 = vpop.f32.mrf.mxu0  ;;  %v4073_v22 = vpack.c.bf16 %v1296_v10, %v1207_v9  ;;  %v1380_v10 = vadd.f32 %v4049_v16, %v3957_v31  ;;  %v1375_v16 = vadd.f32 %v4031_v45, %v3957_v31 }
 0x263   : > { %v1387_v48 = vadd.f32 %v1386_v7, %v3957_v31 }
 0x264   : > { %v1526_v39 = vunpack.c.l.b16 %v4073_v22 }
 0x265   : > { %v948_v13 = vpop.f32.mrf.mxu1  ;;  %v1461_v8 = vpack.c.bf16 %v1387_v48, %v1387_v48 }
 0x266   : > { %v949_v17 = vadd.f32 %v3920_v43, %v948_v13  ;;  %v1459_v13 = vpack.c.bf16 %v1385_v59, %v1385_v59 }
 0x267   : > { %v1208_v20 = vpop.f32.mrf.mxu2  ;;  %v1297_v21 = vpop.f32.mrf.mxu3  ;;  %v1824_v27 = vunpack.c.l.b16 %v1461_v8 }
 0x268   : > { %v1209_v23 = vadd.f32 %v1208_v20, %v3959_v32  ;;  %v1298_v25 = vadd.f32 %v1297_v21, %v3961_v33  ;;  %v982_v28 = vmax.f32 %v949_v17, 0.0 }
 0x26a   : > { %v4077_v29 = vpack.c.bf16 %v1298_v25, %v1209_v23  ;;  %v1389_v35 = vpop.f32.mrf.mxu0  ;;  %v998_v36 = vpack.c.bf16 %v982_v28, %v981_v14  ;;  %v1377_v25 = vadd.f32 %v4041_v1, %v3957_v31  ;;  %v1457_v28 = vpack.c.bf16 %v1382_v6, %v1382_v6 }
 0x26b   : > { %v1390_v41 = vadd.f32 %v1389_v35, %v3957_v31 }
 0x26c   : > { %v1527_v40 = vunpack.c.l.b16 %v4077_v29  ;;  %1250 = vmatmul.bf16.gmra.mxu2 %v998_v36  ;;  %1339 = vmatmul.bf16.gmra.mxu3 %v998_v36  ;;  %v1453_v59 = vpack.c.bf16 %v1377_v25, %v1377_v25 }
 0x26d   : > { %1428 = vmatmul.bf16.gmra.mxu0 %v998_v36  ;;  %v1463_v60 = vpack.c.bf16 %v1390_v41, %v1390_v41  ;;  %v1823_v41 = vunpack.c.l.b16 %v1459_v13  ;;  %v1559_v13 = vunpack.c.h.b16 %v4077_v29 }
 0x26e   : > { %v4081_v43 = vpack.c.b16 %v1527_v40, %v1526_v39  ;;  %v1455_v40 = vpack.c.bf16 %v1380_v10, %v1380_v10  ;;  %v1820_v45 = vunpack.c.l.b16 %v1453_v59 }
 0x26f   : > { %v1211_v44 = vpop.f32.mrf.mxu2  ;;  %v1300_v47 = vpop.f32.mrf.mxu3  ;;  %v1825_v14 = vunpack.c.l.b16 %v1463_v60  ;;  %v1822_v60 = vunpack.c.l.b16 %v1457_v28 }
 0x270   : > { %v1212_v62 = vadd.f32 %v1211_v44, %v3959_v32  ;;  %v1301_v5 = vadd.f32 %v1300_v47, %v3961_v33  ;;  %v1821_v6 = vunpack.c.l.b16 %v1455_v40 }
 0x272   : > { %v1391_v49 = vpop.f32.mrf.mxu0  ;;  %v1462_v53 = vpack.c.bf16 %v1301_v5, %v1212_v62  ;;  %v1451_v5 = vpack.c.bf16 %v1375_v16, %v1375_v16  ;;  %v1832_v10 = vpack.c.b16 %v1822_v60, %v1821_v6 }
 0x273   : > { %v1392_v61 = vadd.f32 %v1391_v49, %v3957_v31 }
 0x274   : > { %v1528_v44 = vunpack.c.l.b16 %v1462_v53  ;;  %v1560_v48 = vunpack.c.h.b16 %v1462_v53 }
 0x275   : > { %v1465_v9 = vpack.c.bf16 %v1392_v61, %v1392_v61  ;;  %v1833_v61 = vpack.c.b16 %v1824_v27, %v1823_v41  ;;  %v1557_v27 = vunpack.c.h.b16 %v4063_v52  ;;  %v1555_v41 = vunpack.c.h.b16 %v4047_v15 }
 0x277   : > { %v1826_v7 = vunpack.c.l.b16 %v1465_v9  ;;  %v1213_v17 = vpop.f32.mrf.mxu2  ;;  %v1302_v20 = vpop.f32.mrf.mxu3  ;;  %v1566_v34 = vpack.c.b16 %v1555_v41, %v1554_v30 }
 0x278   : > { %v1214_v21 = vadd.f32 %v1213_v17, %v3959_v32  ;;  %v1303_v23 = vadd.f32 %v1302_v20, %v3961_v33  ;;  %v1558_v17 = vunpack.c.h.b16 %v4073_v22  ;;  %v1556_v22 = vunpack.c.h.b16 %v4059_v46 }
 0x279   : > { %v1834_v35 = vpack.c.b16 %v1826_v7, %v1825_v14  ;;  %v1819_v7 = vunpack.c.l.b16 %v1451_v5 }
 0x27a   : > { %v1464_v36 = vpack.c.bf16 %v1303_v23, %v1214_v21  ;;  %v4096_v39 = vpop.f32.mrf.mxu0  ;;  %v1568_v53 = vpack.c.b16 %v1559_v13, %v1558_v17 }
 0x27b   : > { %1843 = vmatpush.bf16.msrb.mxu2 %v1834_v35  ;;  %v1831_v20 = vpack.c.b16 %v1820_v45, %v1819_v7 }
 0x27c   : > { %v1529_v47 = vunpack.c.l.b16 %v1464_v36  ;;  %v1561_v49 = vunpack.c.h.b16 %v1464_v36  ;;  %v1567_v36 = vpack.c.b16 %v1557_v27, %v1556_v22 }
 0x27e   : > { %v1569_v1 = vpack.c.b16 %v1561_v49, %v1560_v48  ;;  %v4100_v62 = vpack.c.b16 %v1529_v47, %v1528_v44  ;;  %v1395_v48 = vadd.f32 %v4096_v39, %v3957_v31 }
 0x27f   : > { %1844 = vmatpush.bf16.msrb.mxu2 %v1833_v61  ;;  %v1216_v8 = vpop.f32.mrf.mxu2  ;;  %v1305_v9 = vpop.f32.mrf.mxu3 }
 0x280   : > { %1578 = vmatpush.bf16.xpose.msrb.mxu1 %v1569_v1  ;;  %v1217_v25 = vadd.f32 %v1216_v8, %v3959_v32  ;;  %v1306_v28 = vadd.f32 %v1305_v9, %v3961_v33  ;;  %v1467_v1 = vpack.c.bf16 %v1395_v48, %v1395_v48 }
 0x282   : > { %v1396_v14 = vpop.f32.mrf.mxu0  ;;  %v4111_v29 = vpack.c.bf16 %v1306_v28, %v1217_v25 }
 0x283   : > { %1845 = vmatpush.bf16.msrb.mxu2 %v1832_v10  ;;  %v1397_v49 = vadd.f32 %v1396_v14, %v3957_v31 }
 0x285   : > { %v1469_v5 = vpack.c.bf16 %v1397_v49, %v1397_v49 }
 0x287   : > { %1846 = vmatpush.bf16.msrb.mxu2 %v1831_v20  ;;  %v4104_v21 = vpop.f32.mrf.mxu2  ;;  %v4106_v23 = vpop.f32.mrf.mxu3  ;;  %v4156_v9 = vunpack.c.l.b16 %v1469_v5 }
 0x288   : > { %1579 = vmatpush.bf16.xpose.msrb.mxu1 %v1568_v53 }
 0x28a   : > { %v1399_v35 = vpop.f32.mrf.mxu0 }
 0x28b   : > { %1847 = vmatpush.bf16.msrb.mxu2 %v1830_v42  ;;  %v1400_v13 = vadd.f32 %v1399_v35, %v3957_v31 }
 0x28d   : > { %v1471_v25 = vpack.c.bf16 %v1400_v13, %v1400_v13 }
 0x28f   : > { %1848 = vmatpush.bf16.msrb.mxu2 %v1829_v0  ;;  %v1221_v16 = vpop.f32.mrf.mxu2  ;;  %v1310_v40 = vpop.f32.mrf.mxu3 }
 0x290   : > { %1580 = vmatpush.bf16.xpose.msrb.mxu1 %v1567_v36  ;;  %v1222_v58 = vadd.f32 %v1221_v16, %v3959_v32  ;;  %v1311_v0 = vadd.f32 %v1310_v40, %v3961_v33 }
 0x292   : > { %v1401_v52 = vpop.f32.mrf.mxu0  ;;  %v4134_v15 = vpack.c.bf16 %v1311_v0, %v1222_v58 }
 0x293   : > { %1849 = vmatpush.bf16.msrb.mxu2 %v1828_v24  ;;  %v1402_v14 = vadd.f32 %v1401_v52, %v3957_v31 }
 0x295   : > { %v1473_v28 = vpack.c.bf16 %v1402_v14, %v1402_v14 }
 0x297   : > { %1850 = vmatpush.bf16.msrb.mxu2 %v1827_v57  ;;  %v4128_v42 = vpop.f32.mrf.mxu2  ;;  %v4130_v56 = vpop.f32.mrf.mxu3  ;;  %v4176_v36 = vunpack.c.l.b16 %v1473_v28 }
 0x298   : > { %1581 = vmatpush.bf16.xpose.msrb.mxu1 %v1566_v34 }
 0x29a   : > { %v1404_v18 = vpop.f32.mrf.mxu0 }
 0x29b   : > { %v1405_v41 = vadd.f32 %v1404_v18, %v3957_v31 }
 0x29d   : > { %v1475_v58 = vpack.c.bf16 %v1405_v41, %v1405_v41 }
 0x29f   : > { %v1226_v19 = vpop.f32.mrf.mxu2  ;;  %v1315_v24 = vpop.f32.mrf.mxu3 }
 0x2a0   : > { %1582 = vmatpush.bf16.xpose.msrb.mxu1 %v4033_v54  ;;  %v1227_v63 = vadd.f32 %v1226_v19, %v3959_v32  ;;  %v1316_v50 = vadd.f32 %v1315_v24, %v3961_v33  ;;  %v4191_v24 = vunpack.c.l.b16 %v1475_v58 }
 0x2a2   : > { %v4139_v51 = vpack.c.bf16 %v1316_v50, %v1227_v63  ;;  %v1406_v57 = vpop.f32.mrf.mxu0 }
 0x2a3   : > { %v1407_v52 = vadd.f32 %v1406_v57, %v3957_v31 }
 0x2a5   : > { %v1477_v0 = vpack.c.bf16 %v1407_v52, %v1407_v52 }
 0x2a7   : > { %v4141_v46 = vpop.f32.mrf.mxu2  ;;  %v4143_v44 = vpop.f32.mrf.mxu3  ;;  %v4193_v63 = vunpack.c.l.b16 %v1477_v0 }
 0x2a8   : > { %1583 = vmatpush.bf16.xpose.msrb.mxu1 %v4013_v11  ;;  %v4154_v11 = vunpack.c.l.b16 %v1467_v1 }
 0x2a9   : > { %v2365_v50 = vpack.c.b16 %v4193_v63, %v4191_v24 }
 0x2aa   : > { %v1409_v47 = vpop.f32.mrf.mxu0 }
 0x2ab   : > { %v1410_v57 = vadd.f32 %v1409_v47, %v3957_v31 }
 0x2af   : > { %v1231_v54 = vpop.f32.mrf.mxu2  ;;  %v1320_v59 = vpop.f32.mrf.mxu3 }
 0x2b0   : > { %1584 = vmatpush.bf16.xpose.msrb.mxu1 %v3995_v37  ;;  %v1232_v60 = vadd.f32 %v1231_v54, %v3959_v32  ;;  %v1321_v61 = vadd.f32 %v1320_v59, %v3961_v33 }
 0x2b2   : > { %v4152_v6 = vpack.c.bf16 %v1321_v61, %v1232_v60  ;;  %v1411_v8 = vpop.f32.mrf.mxu0  ;;  %v1479_v60 = vpack.c.bf16 %v1410_v57, %v1410_v57 }
 0x2b3   : > { %v1412_v49 = vadd.f32 %v1411_v8, %v3957_v31 }
 0x2b4   : > { %v4204_v5 = vunpack.c.l.b16 %v1479_v60  ;;  %v2087_v24 = vunpack.c.h.b16 %v4152_v6 }
 0x2b5   : > { %v1481_v61 = vpack.c.bf16 %v1412_v49, %v1412_v49 }
 0x2b7   : > { %v4160_v45 = vpop.f32.mrf.mxu2  ;;  %v4162_v10 = vpop.f32.mrf.mxu3  ;;  %v4206_v13 = vunpack.c.l.b16 %v1481_v61 }
 0x2b8   : > { %1585 = vmatpush.bf16.xpose.msrb.mxu1 %v3977_v2  ;;  %v4174_v2 = vunpack.c.l.b16 %v1471_v25 }
 0x2b9   : > { %v2366_v14 = vpack.c.b16 %v4206_v13, %v4204_v5 }
 0x2ba   : > { %v4165_v37 = vpop.f32.mrf.mxu0 }
 0x2bf   : > { %1586 = vmatmul.bf16.vlgmr.msrb.gmra.mxu1 %v3979_v3  ;;  %v1236_v7 = vpop.f32.mrf.mxu2  ;;  %v1325_v17 = vpop.f32.mrf.mxu3 }
 0x2c0   : > { %v1237_v20 = vadd.f32 %v1236_v7, %v3959_v32  ;;  %v1326_v53 = vadd.f32 %v1325_v17, %v3961_v33 }
 0x2c2   : > { %v4172_v27 = vpack.c.bf16 %v1326_v53, %v1237_v20  ;;  %v1416_v22 = vpop.f32.mrf.mxu0 }
 0x2c7   : > { %v4180_v35 = vpop.f32.mrf.mxu2  ;;  %v4182_v16 = vpop.f32.mrf.mxu3 }
 0x2ca   : > { %v1419_v40 = vpop.f32.mrf.mxu0 }
 0x2cb   : > { %v1420_v28 = vadd.f32 %v1419_v40, %v3957_v31 }
 0x2cd   : > { %v1487_v61 = vpack.c.bf16 %v1420_v28, %v1420_v28 }
 0x2cf   : > { %1591 = vmatmul.bf16.gmra.mxu1 %v3997_v38  ;;  %v4187_v30 = vpop.f32.mrf.mxu2  ;;  %v4189_v34 = vpop.f32.mrf.mxu3 }
 0x2d2   : > { %v1421_v19 = vpop.f32.mrf.mxu0 }
 0x2d3   : > { %v1422_v41 = vadd.f32 %v1421_v19, %v3957_v31  ;;  %v1415_v19 = vadd.f32 %v4165_v37, %v3957_v31  ;;  %v1234_v37 = vadd.f32 %v4160_v45, %v3959_v32 }
 0x2d7   : > { %v4197_v48 = vpop.f32.mrf.mxu2  ;;  %v4199_v38 = vpop.f32.mrf.mxu3 }
 0x2da   : > { %v1424_v18 = vpop.f32.mrf.mxu0 }
 0x2db   : > { %v1425_v53 = vadd.f32 %v1424_v18, %v3957_v31 }
 0x2dd   : > { %v1491_v49 = vpack.c.bf16 %v1425_v53, %v1425_v53 }
 0x2df   : > { %1596 = vmatmul.bf16.gmra.mxu1 %v4015_v12  ;;  %v1246_v54 = vpop.f32.mrf.mxu2  ;;  %v1335_v59 = vpop.f32.mrf.mxu3 }
 0x2e0   : > { %v1336_v40 = vadd.f32 %v1335_v59, %v3961_v33 }
 0x2e2   : > { %v1426_v1 = vpop.f32.mrf.mxu0 }
 0x2e3   : > { %v1427_v25 = vadd.f32 %v1426_v1, %v3957_v31  ;;  %v1247_v1 = vadd.f32 %v1246_v54, %v3959_v32 }
 0x2e5   : > { %v1493_v60 = vpack.c.bf16 %v1427_v25, %v1427_v25  ;;  %v2359_v25 = vunpack.c.l.b16 %v1491_v49  ;;  %v1483_v49 = vpack.c.bf16 %v1415_v19, %v1415_v19 }
 0x2e7   : > { %v1248_v7 = vpop.f32.mrf.mxu2  ;;  %v1337_v17 = vpop.f32.mrf.mxu3  ;;  %v2360_v3 = vunpack.c.l.b16 %v1493_v60  ;;  %v2355_v19 = vunpack.c.l.b16 %v1483_v49 }
 0x2e8   : > { %v1249_v28 = vadd.f32 %v1248_v7, %v3959_v32 }
 0x2ea   : > { %v1429_v20 = vpop.f32.mrf.mxu0 }
 0x2eb   : > { %v1430_v12 = vadd.f32 %v1429_v20, %v3957_v31  ;;  %v1489_v20 = vpack.c.bf16 %v1422_v41, %v1422_v41  ;;  %v1338_v41 = vadd.f32 %v1337_v17, %v3961_v33  ;;  %v2369_v17 = vpack.c.b16 %v2360_v3, %v2359_v25 }
 0x2ed   : > { %v1495_v52 = vpack.c.bf16 %v1430_v12, %v1430_v12  ;;  %v2358_v60 = vunpack.c.l.b16 %v1489_v20 }
 0x2ef   : > { %1601 = vmatmul.bf16.gmra.mxu1 %v4035_v55  ;;  %v1251_v47 = vpop.f32.mrf.mxu2  ;;  %v1340_v8 = vpop.f32.mrf.mxu3  ;;  %v2361_v39 = vunpack.c.l.b16 %v1495_v52 }
 0x2f0   : > { %v1252_v58 = vadd.f32 %v1251_v47, %v3959_v32  ;;  %v1341_v0 = vadd.f32 %v1340_v8, %v3961_v33  ;;  %v1417_v47 = vadd.f32 %v1416_v22, %v3957_v31 }
 0x2f2   : > { %v1431_v57 = vpop.f32.mrf.mxu0  ;;  %v4223_v12 = vpack.c.bf16 %v1341_v0, %v1252_v58  ;;  %v2357_v58 = vunpack.c.l.b16 %v1487_v61  ;;  %v1485_v7 = vpack.c.bf16 %v1417_v47, %v1417_v47  ;;  %v1331_v61 = vadd.f32 %v4189_v34, %v3961_v33 }
 0x2f3   : > { %v1432_v55 = vadd.f32 %v1431_v57, %v3957_v31  ;;  %v1323_v31 = vadd.f32 %v4162_v10, %v3961_v33  ;;  %v1242_v10 = vadd.f32 %v4187_v30, %v3959_v32 }
 0x2f4   : > { %v2095_v22 = vunpack.c.h.b16 %v4223_v12  ;;  %v2356_v20 = vunpack.c.l.b16 %v1485_v7  ;;  %v2368_v3 = vpack.c.b16 %v2358_v60, %v2357_v58  ;;  %v4736_v58 = vpack.c.b16 %v4176_v36, %v4174_v2 }
 0x2f5   : > { %v1497_v18 = vpack.c.bf16 %v1432_v55, %v1432_v55  ;;  %v4237_v55 = vpack.c.bf16 %v1336_v40, %v1247_v1  ;;  %v1244_v1 = vadd.f32 %v4197_v48, %v3959_v32  ;;  %v1333_v40 = vadd.f32 %v4199_v38, %v3961_v33 }
 0x2f6   : > { %v2367_v25 = vpack.c.b16 %v2356_v20, %v2355_v19  ;;  %v1239_v48 = vadd.f32 %v4180_v35, %v3959_v32  ;;  %v1328_v38 = vadd.f32 %v4182_v16, %v3961_v33  ;;  %v2089_v35 = vunpack.c.h.b16 %v4172_v27 }
 0x2f7   : > { %v1253_v8 = vpop.f32.mrf.mxu2  ;;  %v1342_v53 = vpop.f32.mrf.mxu3  ;;  %v2362_v57 = vunpack.c.l.b16 %v1497_v18  ;;  %v4239_v18 = vpack.c.bf16 %v1338_v41, %v1249_v28  ;;  %v2093_v47 = vunpack.c.h.b16 %v4237_v55  ;;  %v2057_v16 = vunpack.c.l.b16 %v4172_v27 }
 0x2f8   : > { %v1254_v54 = vadd.f32 %v1253_v8, %v3959_v32  ;;  %v1343_v59 = vadd.f32 %v1342_v53, %v3961_v33  ;;  %v2055_v53 = vunpack.c.l.b16 %v4152_v6  ;;  %v1318_v27 = vadd.f32 %v4143_v44, %v3961_v33 }
 0x2f9   : > { %v2370_v52 = vpack.c.b16 %v2362_v57, %v2361_v39  ;;  %v1480_v39 = vpack.c.bf16 %v1323_v31, %v1234_v37  ;;  %v2094_v30 = vunpack.c.h.b16 %v4239_v18  ;;  %v1488_v57 = vpack.c.bf16 %v1333_v40, %v1244_v1 }
 0x2fa   : > { %v4235_v0 = vpack.c.bf16 %v1343_v59, %v1254_v54  ;;  %v1484_v37 = vpack.c.bf16 %v1328_v38, %v1239_v48  ;;  %v1313_v6 = vadd.f32 %v4130_v56, %v3961_v33  ;;  %v1219_v44 = vadd.f32 %v4104_v21, %v3959_v32 }
 0x2fb   : > { %2379 = vmatpush.bf16.msra.mxu2 %v2370_v52  ;;  %v2056_v34 = vunpack.c.l.b16 %v1480_v39  ;;  %v2103_v28 = vpack.c.b16 %v2094_v30, %v2093_v47  ;;  %v2092_v59 = vunpack.c.h.b16 %v1488_v57  ;;  %v2088_v63 = vunpack.c.h.b16 %v1480_v39 }
 0x2fc   : > { %v2096_v45 = vunpack.c.h.b16 %v4235_v0  ;;  %v2090_v31 = vunpack.c.h.b16 %v1484_v37  ;;  %v2060_v49 = vunpack.c.l.b16 %v1488_v57  ;;  %v2061_v56 = vunpack.c.l.b16 %v4237_v55 }
 0x2fd   : > { %v4254_v41 = vpack.c.b16 %v2056_v34, %v2055_v53  ;;  %v2064_v1 = vunpack.c.l.b16 %v4235_v0  ;;  %v2051_v40 = vunpack.c.l.b16 %v4134_v15  ;;  %v2053_v34 = vunpack.c.l.b16 %v4139_v51 }
 0x2fe   : > { %v2104_v8 = vpack.c.b16 %v2096_v45, %v2095_v22  ;;  %v2058_v22 = vunpack.c.l.b16 %v1484_v37  ;;  %v2101_v5 = vpack.c.b16 %v2090_v31, %v2089_v35  ;;  %v2083_v45 = vunpack.c.h.b16 %v4134_v15 }
 0x2ff   : > { %1606 = vmatmul.bf16.gmra.mxu1 %v4053_v26  ;;  %2380 = vmatpush.bf16.msra.mxu2 %v2369_v17  ;;  %v1486_v26 = vpack.c.bf16 %v1331_v61, %v1242_v10  ;;  %v2081_v61 = vunpack.c.h.b16 %v4111_v29 }
 0x300   : > { %2113 = vmatpush.bf16.xpose.msra.mxu1 %v2104_v8  ;;  %v4272_v13 = vpack.c.b16 %v2058_v22, %v2057_v16  ;;  %v2062_v8 = vunpack.c.l.b16 %v4239_v18 }
 0x301   : > { %v2091_v54 = vunpack.c.h.b16 %v1486_v26  ;;  %v2059_v36 = vunpack.c.l.b16 %v1486_v26 }
 0x302   : > { %v2071_v20 = vpack.c.b16 %v2062_v8, %v2061_v56 }
 0x303   : > { %2381 = vmatpush.bf16.msra.mxu2 %v2368_v3  ;;  %v2102_v52 = vpack.c.b16 %v2092_v59, %v2091_v54 }
 0x307   : > { %2382 = vmatpush.bf16.msra.mxu2 %v2367_v25 }
 0x308   : > { %2114 = vmatpush.bf16.xpose.msra.mxu1 %v2103_v28 }
 0x30b   : > { %2383 = vmatpush.bf16.msra.mxu2 %v2366_v14  ;;  %v2100_v14 = vpack.c.b16 %v2088_v63, %v2087_v24 }
 0x30f   : > { %1611 = vmatmul.bf16.gmra.mxu1 %v4067_v4  ;;  %2384 = vmatpush.bf16.msra.mxu2 %v2365_v50  ;;  %v4737_v4 = vpack.c.b16 %v4156_v9, %v4154_v11  ;;  %v1229_v50 = vadd.f32 %v4141_v46, %v3959_v32  ;;  %v1224_v11 = vadd.f32 %v4128_v42, %v3959_v32  ;;  %v2085_v9 = vunpack.c.h.b16 %v4139_v51 }
 0x310   : > { %2115 = vmatpush.bf16.xpose.msra.mxu1 %v2102_v52  ;;  %v2070_v46 = vpack.c.b16 %v2060_v49, %v2059_v36 }
 0x311   : > { %v1476_v2 = vpack.c.bf16 %v1318_v27, %v1229_v50  ;;  %v1472_v60 = vpack.c.bf16 %v1313_v6, %v1224_v11 }
 0x313   : > { %2385 = vmatpush.bf16.msra.mxu2 %v4736_v58  ;;  %v2086_v7 = vunpack.c.h.b16 %v1476_v2  ;;  %v2084_v39 = vunpack.c.h.b16 %v1472_v60  ;;  %v2052_v47 = vunpack.c.l.b16 %v1472_v60  ;;  %v2054_v25 = vunpack.c.l.b16 %v1476_v2 }
 0x315   : > { %v2099_v17 = vpack.c.b16 %v2086_v7, %v2085_v9  ;;  %v2098_v10 = vpack.c.b16 %v2084_v39, %v2083_v45  ;;  %v2066_v53 = vpack.c.b16 %v2052_v47, %v2051_v40 }
 0x317   : > { %2386 = vmatpush.bf16.msra.mxu2 %v4737_v4 }
 0x318   : > { %2116 = vmatpush.bf16.xpose.msra.mxu1 %v2101_v5 }
 0x31f   : > { %1616 = vmatmul.bf16.gmra.mxu1 %v4081_v43  ;;  %v1308_v43 = vadd.f32 %v4106_v23, %v3961_v33  ;;  %v2049_v33 = vunpack.c.l.b16 %v4111_v29 }
 0x320   : > { %2117 = vmatpush.bf16.xpose.msra.mxu1 %v2100_v14 }
 0x321   : > { %v1468_v42 = vpack.c.bf16 %v1308_v43, %v1219_v44 }
 0x323   : > { %v2082_v19 = vunpack.c.h.b16 %v1468_v42  ;;  %v2050_v21 = vunpack.c.l.b16 %v1468_v42 }
 0x325   : > { %v2097_v32 = vpack.c.b16 %v2082_v19, %v2081_v61  ;;  %v2065_v3 = vpack.c.b16 %v2050_v21, %v2049_v33 }
 0x328   : > { %2118 = vmatpush.bf16.xpose.msra.mxu1 %v2099_v17 }
 0x32f   : > { %1621 = vmatmul.bf16.gmra.mxu1 %v4100_v62  ;;  %v2063_v62 = vunpack.c.l.b16 %v4223_v12  ;;  %v2067_v12 = vpack.c.b16 %v2054_v25, %v2053_v34 }
 0x330   : > { %2119 = vmatpush.bf16.xpose.msra.mxu1 %v2098_v10 }
 0x331   : > { %v2072_v18 = vpack.c.b16 %v2064_v1, %v2063_v62 }
 0x338   : > { %2120 = vmatpush.bf16.xpose.msra.mxu1 %v2097_v32 }
 0x33c   : > { %v1587_v23 = vpop.f32.mrf.mxu1 }
 0x33d   : > { %1627 = vmax.xlane.f32.xlu0 %v1587_v23 }
 0x33f   : > { %2121 = vmatmul.bf16.vlgmr.msra.gmra.mxu1 %v2065_v3 }
 0x344   : > { %v1589_v55 = vpop.f32.mrf.mxu1 }
 0x345   : > { %1629 = vmax.xlane.f32.xlu0 %v1589_v55 }
 0x34c   : > { %v1592_v30 = vpop.f32.mrf.mxu1 }
 0x34d   : > { %1631 = vmax.xlane.f32.xlu1 %v1592_v30 }
 0x34f   : > { %2126 = vmatmul.bf16.gmra.mxu1 %v2066_v53 }
 0x354   : > { %v1594_v29 = vpop.f32.mrf.mxu1 }
 0x355   : > { %1633 = vmax.xlane.f32.xlu1 %v1594_v29 }
 0x35c   : > { %v1597_v26 = vpop.f32.mrf.mxu1 }
 0x35d   : > { %1635 = vmax.xlane.f32.xlu2 %v1597_v26 }
 0x35f   : > { %2131 = vmatmul.bf16.gmra.mxu1 %v2067_v12 }
 0x364   : > { %v1599_v0 = vpop.f32.mrf.mxu1 }
 0x365   : > { %1637 = vmax.xlane.f32.xlu2 %v1599_v0 }
 0x36c   : > { %v1602_v57 = vpop.f32.mrf.mxu1 }
 0x36d   : > { %1639 = vmax.xlane.f32.xlu0 %v1602_v57 }
 0x36f   : > { %2136 = vmatmul.bf16.gmra.mxu1 %v4254_v41 }
 0x374   : > { %v1604_v15 = vpop.f32.mrf.mxu1 }
 0x375   : > { %1641 = vmax.xlane.f32.xlu1 %v1604_v15 }
 0x37c   : > { %v4303_v28 = vpop.f32.mrf.mxu1 }
 0x37d   : > { %1643 = vmax.xlane.f32.xlu1 %v4303_v28 }
 0x37f   : > { %2141 = vmatmul.bf16.gmra.mxu1 %v4272_v13 }
 0x384   : > { %v4307_v48 = vpop.f32.mrf.mxu1 }
 0x38c   : > { %v4311_v52 = vpop.f32.mrf.mxu1 }
 0x38f   : > { %2146 = vmatmul.bf16.gmra.mxu1 %v2070_v46 }
 0x394   : > { %v4318_v5 = vpop.f32.mrf.mxu1 }
 0x39c   : > { %v4324_v50 = vpop.f32.mrf.mxu1 }
 0x39f   : > { %2151 = vmatmul.bf16.gmra.mxu1 %v2071_v20 }
 0x3a4   : > { %v4330_v11 = vpop.f32.mrf.mxu1 }
 0x3ac   : > { %v4338_v44 = vpop.f32.mrf.mxu1 }
 0x3af   : > { %2156 = vmatmul.bf16.gmra.mxu1 %v2072_v18 }
 0x3b0   : > { %v1628_v51 = vpop.xlane.xlu0 %1627 }
 0x3b1   : > { %v1659_v38 = vsub.f32 %v1587_v23, %v1628_v51 }
 0x3b3   : > { %v1675_v54 = vmul.f32 1.442695, %v1659_v38 }
 0x3b4   : > { %v4346_v56 = vpop.f32.mrf.mxu1 }
 0x3b5   : > { %3283 = vpow2.f32 %v1675_v54 }
 0x3b8   : > { %v1630_v59 = vpop.xlane.xlu0 %1629 }
 0x3b9   : > { %v1660_v37 = vsub.f32 %v1589_v55, %v1630_v59 }
 0x3bb   : > { %v4309_v41 = vpop.eup %3283  ;;  %v1677_v35 = vmul.f32 1.442695, %v1660_v37 }
 0x3bc   : > { %1707 = vadd.xlane.f32.xlu2 %v4309_v41  ;;  %v4353_v32 = vpop.f32.mrf.mxu1 }
 0x3bd   : > { %3285 = vpow2.f32 %v1677_v35 }
 0x3c0   : > { %v1632_v31 = vpop.xlane.xlu1 %1631 }
 0x3c1   : > { %v1661_v16 = vsub.f32 %v1592_v30, %v1632_v31 }
 0x3c3   : > { %v4314_v22 = vpop.eup %3285  ;;  %v1679_v58 = vmul.f32 1.442695, %v1661_v16 }
 0x3c4   : > { %1709 = vadd.xlane.f32.xlu0 %v4314_v22  ;;  %1645 = vmax.xlane.f32.xlu2 %v4307_v48  ;;  %v4359_v21 = vpop.f32.mrf.mxu1 }
 0x3c5   : > { %3287 = vpow2.f32 %v1679_v58 }
 0x3c8   : > { %v1634_v13 = vpop.xlane.xlu1 %1633 }
 0x3c9   : > { %v1662_v4 = vsub.f32 %v1594_v29, %v1634_v13 }
 0x3cb   : > { %v4320_v24 = vpop.eup %3287  ;;  %v1681_v63 = vmul.f32 1.442695, %v1662_v4 }
 0x3cc   : > { %1711 = vadd.xlane.f32.xlu0 %v4320_v24  ;;  %1647 = vmax.xlane.f32.xlu2 %v4311_v52  ;;  %v4362_v23 = vpop.f32.mrf.mxu1 }
 0x3cd   : > { %3289 = vpow2.f32 %v1681_v63 }
 0x3d0   : > { %v1636_v27 = vpop.xlane.xlu2 %1635 }
 0x3d1   : > { %v1663_v14 = vsub.f32 %v1597_v26, %v1636_v27 }
 0x3d3   : > { %v4326_v2 = vpop.eup %3289  ;;  %v1683_v36 = vmul.f32 1.442695, %v1663_v14 }
 0x3d4   : > { %1713 = vadd.xlane.f32.xlu1 %v4326_v2  ;;  %1649 = vmax.xlane.f32.xlu0 %v4318_v5  ;;  %v4374_v25 = vpop.f32.mrf.mxu1 }
 0x3d5   : > { %3291 = vpow2.f32 %v1683_v36 }
 0x3d8   : > { %v1638_v49 = vpop.xlane.xlu2 %1637 }
 0x3d9   : > { %v1664_v6 = vsub.f32 %v1599_v0, %v1638_v49 }
 0x3db   : > { %v4332_v9 = vpop.eup %3291  ;;  %v1685_v7 = vmul.f32 1.442695, %v1664_v6 }
 0x3dc   : > { %1715 = vadd.xlane.f32.xlu1 %v4332_v9  ;;  %1651 = vmax.xlane.f32.xlu0 %v4324_v50  ;;  %v4386_v59 = vpop.f32.mrf.mxu1 }
 0x3dd   : > { %3293 = vpow2.f32 %v1685_v7 }
 0x3e0   : > { %v1640_v46 = vpop.xlane.xlu0 %1639 }
 0x3e1   : > { %v1665_v60 = vsub.f32 %v1602_v57, %v1640_v46 }
 0x3e3   : > { %v4336_v17 = vpop.eup %3293  ;;  %v1687_v43 = vmul.f32 1.442695, %v1665_v60 }
 0x3e4   : > { %1717 = vadd.xlane.f32.xlu2 %v4336_v17  ;;  %1653 = vmax.xlane.f32.xlu1 %v4330_v11  ;;  %v4395_v13 = vpop.f32.mrf.mxu1 }
 0x3e5   : > { %3295 = vpow2.f32 %v1687_v43 }
 0x3e8   : > { %v1642_v45 = vpop.xlane.xlu1 %1641 }
 0x3e9   : > { %v1666_v39 = vsub.f32 %v1604_v15, %v1642_v45 }
 0x3eb   : > { %v4342_v42 = vpop.eup %3295  ;;  %v1689_v10 = vmul.f32 1.442695, %v1666_v39 }
 0x3ec   : > { %1719 = vadd.xlane.f32.xlu2 %v4342_v42  ;;  %1655 = vmax.xlane.f32.xlu1 %v4338_v44  ;;  %v4405_v49 = vpop.f32.mrf.mxu1 }
 0x3ed   : > { %3297 = vpow2.f32 %v1689_v10 }
 0x3f0   : > { %v1644_v8 = vpop.xlane.xlu1 %1643 }
 0x3f1   : > { %v1667_v61 = vsub.f32 %v4303_v28, %v1644_v8 }
 0x3f3   : > { %v4349_v19 = vpop.eup %3297  ;;  %v1691_v20 = vmul.f32 1.442695, %v1667_v61 }
 0x3f4   : > { %1721 = vadd.xlane.f32.xlu0 %v4349_v19  ;;  %1657 = vmax.xlane.f32.xlu2 %v4346_v56  ;;  %v4415_v8 = vpop.f32.mrf.mxu1 }
 0x3f5   : > { %3299 = vpow2.f32 %v1691_v20 }
 0x3fb   : > { %v4355_v33 = vpop.eup %3299 }
 0x3fc   : > { %1723 = vadd.xlane.f32.xlu0 %v4355_v33  ;;  %2162 = vmax.xlane.f32.xlu2 %v4353_v32 }
 0x404   : > { %2164 = vmax.xlane.f32.xlu0 %v4359_v21 }
 0x40c   : > { %2166 = vmax.xlane.f32.xlu0 %v4362_v23 }
 0x42f   : > { %v1708_v3 = vpop.xlane.xlu2 %1707 }
 0x430   : > { %3301 = vrcp.f32 %v1708_v3 }
 0x436   : > { %v3302_v62 = vpop.eup %3301 }
 0x437   : > { %v1755_v1 = vmul.f32 %v3302_v62, %v4309_v41  ;;  %v1710_v55 = vpop.xlane.xlu0 %1709  ;;  %v1646_v18 = vpop.xlane.xlu2 %1645 }
 0x438   : > { %3303 = vrcp.f32 %v1710_v55  ;;  %v1668_v40 = vsub.f32 %v4307_v48, %v1646_v18 }
 0x439   : > { %1771 = vst [vmem:[%s4370_s11] sm:$0xff] %v1755_v1 }
 0x43a   : > { %v1693_v47 = vmul.f32 1.442695, %v1668_v40  ;;  %v4428_v40 = vpop.f32.mrf.mxu1 }
 0x43c   : > { %3305 = vpow2.f32 %v1693_v47 }
 0x43e   : > { %v3304_v30 = vpop.eup %3303 }
 0x43f   : > { %v1756_v53 = vmul.f32 %v3304_v30, %v4314_v22  ;;  %v1712_v29 = vpop.xlane.xlu0 %1711  ;;  %v1648_v34 = vpop.xlane.xlu2 %1647 }
 0x440   : > { %3307 = vrcp.f32 %v1712_v29  ;;  %v1669_v26 = vsub.f32 %v4311_v52, %v1648_v34 }
 0x441   : > { %1772 = vst [vmem:[%s4370_s11 + $0x8] sm:$0xff] %v1756_v53  ;;  %v1787_v12 = vpack.c.bf16 %v1756_v53, %v1755_v1 }
 0x442   : > { %v4378_v0 = vpop.eup %3305  ;;  %v1695_v57 = vmul.f32 1.442695, %v1669_v26  ;;  %v3168_v26 = vld [vmem:[#allocation10 + $0x38] sm:$0xff] }
 0x443   : > { %1851 = vmatmul.bf16.vlgmr.msrb.gmra.mxu2 %v1787_v12  ;;  %1725 = vadd.xlane.f32.xlu1 %v4378_v0  ;;  %v4438_v12 = vpop.f32.mrf.mxu1 }
 0x444   : > { %3309 = vpow2.f32 %v1695_v57  ;;  %1968 = vmatpush.bf16.msrb.mxu3 %v3168_v26  ;;  %v3167_v57 = vld [vmem:[#allocation10 + $0x30] sm:$0xff] }
 0x446   : > { %v3308_v15 = vpop.eup %3307 }
 0x447   : > { %v1714_v28 = vpop.xlane.xlu1 %1713  ;;  %v1650_v51 = vpop.xlane.xlu0 %1649  ;;  %v1757_v48 = vmul.f32 %v3308_v15, %v4320_v24 }
 0x448   : > { %3311 = vrcp.f32 %v1714_v28  ;;  %v1670_v38 = vsub.f32 %v4318_v5, %v1650_v51  ;;  %1969 = vmatpush.bf16.msrb.mxu3 %v3167_v57 }
 0x449   : > { %1773 = vst [vmem:[%s4370_s11 + $0x10] sm:$0xff] %v1757_v48 }
 0x44a   : > { %v4384_v54 = vpop.eup %3309  ;;  %v1697_v37 = vmul.f32 1.442695, %v1670_v38 }
 0x44b   : > { %1727 = vadd.xlane.f32.xlu1 %v4384_v54  ;;  %v4446_v51 = vpop.f32.mrf.mxu1 }
 0x44c   : > { %3313 = vpow2.f32 %v1697_v37  ;;  %v3165_v37 = vld [vmem:[#allocation10 + $0x20] sm:$0xff] }
 0x44e   : > { %v3312_v41 = vpop.eup %3311 }
 0x44f   : > { %v1716_v52 = vpop.xlane.xlu1 %1715  ;;  %v1652_v35 = vpop.xlane.xlu0 %1651  ;;  %v1758_v31 = vmul.f32 %v3312_v41, %v4326_v2 }
 0x450   : > { %3315 = vrcp.f32 %v1716_v52  ;;  %v1671_v16 = vsub.f32 %v4324_v50, %v1652_v35  ;;  %v3164_v52 = vld [vmem:[#allocation10 + $0x18] sm:$0xff]  ;;  %v3163_v35 = vld [vmem:[#allocation10 + $0x10] sm:$0xff] }
 0x451   : > { %1774 = vst [vmem:[%s4370_s11 + $0x18] sm:$0xff] %v1758_v31  ;;  %v1788_v22 = vpack.c.bf16 %v1758_v31, %v1757_v48  ;;  %v3162_v31 = vld [vmem:[#allocation10 + $0x8] sm:$0xff] }
 0x452   : > { %v4392_v58 = vpop.eup %3313  ;;  %v1699_v5 = vmul.f32 1.442695, %v1671_v16  ;;  %v3161_v16 = vld [vmem:[#allocation10] sm:$0xff] }
 0x453   : > { %1856 = vmatmul.bf16.gmra.mxu2 %v1788_v22  ;;  %1729 = vadd.xlane.f32.xlu2 %v4392_v58  ;;  %v4452_v38 = vpop.f32.mrf.mxu1 }
 0x454   : > { %3317 = vpow2.f32 %v1699_v5  ;;  %2168 = vmax.xlane.f32.xlu1 %v4374_v25 }
 0x456   : > { %v3316_v4 = vpop.eup %3315 }
 0x457   : > { %v1718_v24 = vpop.xlane.xlu2 %1717  ;;  %v1654_v63 = vpop.xlane.xlu1 %1653  ;;  %v1759_v27 = vmul.f32 %v3316_v4, %v4332_v9 }
 0x458   : > { %3319 = vrcp.f32 %v1718_v24  ;;  %v1672_v50 = vsub.f32 %v4330_v11, %v1654_v63 }
 0x459   : > { %1775 = vst [vmem:[%s4370_s11 + $0x20] sm:$0xff] %v1759_v27 }
 0x45a   : > { %v4401_v14 = vpop.eup %3317  ;;  %v1701_v2 = vmul.f32 1.442695, %v1672_v50 }
 0x45b   : > { %1731 = vadd.xlane.f32.xlu2 %v4401_v14  ;;  %v4455_v41 = vpop.f32.mrf.mxu1 }
 0x45c   : > { %3321 = vpow2.f32 %v1701_v2  ;;  %2170 = vmax.xlane.f32.xlu1 %v4386_v59 }
 0x45e   : > { %v3320_v36 = vpop.eup %3319 }
 0x45f   : > { %v1720_v6 = vpop.xlane.xlu2 %1719  ;;  %v1656_v7 = vpop.xlane.xlu1 %1655  ;;  %v1760_v9 = vmul.f32 %v3320_v36, %v4336_v17 }
 0x460   : > { %3323 = vrcp.f32 %v1720_v6  ;;  %v1673_v46 = vsub.f32 %v4338_v44, %v1656_v7 }
 0x461   : > { %1776 = vst [vmem:[%s4370_s11 + $0x28] sm:$0xff] %v1760_v9  ;;  %v1789_v11 = vpack.c.bf16 %v1760_v9, %v1759_v27 }
 0x462   : > { %v4410_v60 = vpop.eup %3321  ;;  %v1703_v43 = vmul.f32 1.442695, %v1673_v46 }
 0x463   : > { %1861 = vmatmul.bf16.gmra.mxu2 %v1789_v11  ;;  %1733 = vadd.xlane.f32.xlu0 %v4410_v60 }
 0x464   : > { %3325 = vpow2.f32 %v1703_v43  ;;  %2172 = vmax.xlane.f32.xlu2 %v4395_v13 }
 0x466   : > { %v3324_v45 = vpop.eup %3323 }
 0x467   : > { %v1722_v39 = vpop.xlane.xlu0 %1721  ;;  %v1658_v10 = vpop.xlane.xlu2 %1657  ;;  %v1761_v17 = vmul.f32 %v3324_v45, %v4342_v42 }
 0x468   : > { %3327 = vrcp.f32 %v1722_v39  ;;  %v1674_v44 = vsub.f32 %v4346_v56, %v1658_v10 }
 0x469   : > { %1777 = vst [vmem:[%s4370_s11 + $0x30] sm:$0xff] %v1761_v17 }
 0x46a   : > { %v4419_v61 = vpop.eup %3325  ;;  %v1705_v20 = vmul.f32 1.442695, %v1674_v44 }
 0x46b   : > { %1735 = vadd.xlane.f32.xlu0 %v4419_v61 }
 0x46c   : > { %3329 = vpow2.f32 %v1705_v20  ;;  %2174 = vmax.xlane.f32.xlu2 %v4405_v49 }
 0x46e   : > { %v3328_v3 = vpop.eup %3327 }
 0x46f   : > { %v1724_v62 = vpop.xlane.xlu0 %1723  ;;  %v2163_v1 = vpop.xlane.xlu2 %2162  ;;  %v1762_v42 = vmul.f32 %v3328_v3, %v4349_v19 }
 0x470   : > { %3331 = vrcp.f32 %v1724_v62  ;;  %v2194_v55 = vsub.f32 %v4353_v32, %v2163_v1 }
 0x471   : > { %1778 = vst [vmem:[%s4370_s11 + $0x38] sm:$0xff] %v1762_v42  ;;  %v1790_v56 = vpack.c.bf16 %v1762_v42, %v1761_v17 }
 0x472   : > { %v4426_v18 = vpop.eup %3329  ;;  %v2210_v47 = vmul.f32 1.442695, %v2194_v55 }
 0x473   : > { %1866 = vmatmul.bf16.gmra.mxu2 %v1790_v56  ;;  %1737 = vadd.xlane.f32.xlu1 %v4426_v18  ;;  %v4475_v56 = vpop.f32.mrf.mxu1 }
 0x474   : > { %3333 = vpow2.f32 %v2210_v47  ;;  %2176 = vmax.xlane.f32.xlu0 %v4415_v8 }
 0x476   : > { %v3332_v30 = vpop.eup %3331 }
 0x477   : > { %v2165_v53 = vpop.xlane.xlu0 %2164  ;;  %v1763_v19 = vmul.f32 %v3332_v30, %v4355_v33 }
 0x478   : > { %v2195_v29 = vsub.f32 %v4359_v21, %v2165_v53 }
 0x479   : > { %1779 = vst [vmem:[%s4370_s11 + $0x40] sm:$0xff] %v1763_v19 }
 0x47a   : > { %v4435_v32 = vpop.eup %3333  ;;  %v2212_v34 = vmul.f32 1.442695, %v2195_v29 }
 0x47b   : > { %2242 = vadd.xlane.f32.xlu1 %v4435_v32 }
 0x47c   : > { %3335 = vpow2.f32 %v2212_v34  ;;  %2178 = vmax.xlane.f32.xlu0 %v4428_v40 }
 0x47f   : > { %v2167_v15 = vpop.xlane.xlu0 %2166 }
 0x480   : > { %v2196_v28 = vsub.f32 %v4362_v23, %v2167_v15  ;;  %v3166_v23 = vld [vmem:[#allocation10 + $0x28] sm:$0xff] }
 0x481   : > { %1970 = vmatpush.bf16.msrb.mxu3 %v3166_v23 }
 0x482   : > { %v4442_v33 = vpop.eup %3335  ;;  %v2214_v21 = vmul.f32 1.442695, %v2196_v28 }
 0x483   : > { %2244 = vadd.xlane.f32.xlu2 %v4442_v33  ;;  %2180 = vmax.xlane.f32.xlu1 %v4438_v12 }
 0x484   : > { %3337 = vpow2.f32 %v2214_v21  ;;  %v4485_v21 = vpop.f32.mrf.mxu1 }
 0x485   : > { %1971 = vmatpush.bf16.msrb.mxu3 %v3165_v37 }
 0x489   : > { %1972 = vmatpush.bf16.msrb.mxu3 %v3164_v52 }
 0x48a   : > { %v4448_v48 = vpop.eup %3337 }
 0x48b   : > { %2246 = vadd.xlane.f32.xlu2 %v4448_v48  ;;  %2182 = vmax.xlane.f32.xlu1 %v4446_v51 }
 0x48d   : > { %1973 = vmatpush.bf16.msrb.mxu3 %v3163_v35 }
 0x491   : > { %1974 = vmatpush.bf16.msrb.mxu3 %v3162_v31 }
 0x493   : > { %2184 = vmax.xlane.f32.xlu2 %v4452_v38 }
 0x495   : > { %1975 = vmatpush.bf16.msrb.mxu3 %v3161_v16 }
 0x49b   : > { %2186 = vmax.xlane.f32.xlu2 %v4455_v41 }
 0x4b6   : > { %v1726_v22 = vpop.xlane.xlu1 %1725 }
 0x4b7   : > { %3339 = vrcp.f32 %v1726_v22 }
 0x4bd   : > { %v3340_v5 = vpop.eup %3339 }
 0x4be   : > { %v1728_v4 = vpop.xlane.xlu1 %1727  ;;  %v1764_v24 = vmul.f32 %v3340_v5, %v4378_v0 }
 0x4bf   : > { %3341 = vrcp.f32 %v1728_v4 }
 0x4c0   : > { %1780 = vst [vmem:[%s4370_s11 + $0x48] sm:$0xff] %v1764_v24  ;;  %v1791_v63 = vpack.c.bf16 %v1764_v24, %v1763_v19 }
 0x4c2   : > { %1871 = vmatmul.bf16.gmra.mxu2 %v1791_v63  ;;  %v4498_v63 = vpop.f32.mrf.mxu1 }
 0x4c5   : > { %v3342_v27 = vpop.eup %3341 }
 0x4c6   : > { %v1852_v50 = vpop.f32.mrf.mxu2  ;;  %v1730_v2 = vpop.xlane.xlu2 %1729  ;;  %v1765_v36 = vmul.f32 %v3342_v27, %v4384_v54 }
 0x4c7   : > { %3343 = vrcp.f32 %v1730_v2  ;;  %v2169_v6 = vpop.xlane.xlu1 %2168 }
 0x4c8   : > { %v2197_v7 = vsub.f32 %v4374_v25, %v2169_v6  ;;  %1781 = vst [vmem:[%s4370_s11 + $0x50] sm:$0xff] %v1765_v36 }
 0x4ca   : > { %v2216_v9 = vmul.f32 1.442695, %v2197_v7 }
 0x4cc   : > { %3345 = vpow2.f32 %v2216_v9 }
 0x4cd   : > { %v3344_v46 = vpop.eup %3343 }
 0x4ce   : > { %v1854_v11 = vpop.f32.mrf.mxu2  ;;  %v1732_v0 = vpop.xlane.xlu2 %1731  ;;  %v1766_v43 = vmul.f32 %v3344_v46, %v4392_v58 }
 0x4cf   : > { %v1892_v45 = vpack.c.bf16 %v1854_v11, %v1852_v50  ;;  %3347 = vrcp.f32 %v1732_v0  ;;  %v2171_v39 = vpop.xlane.xlu1 %2170 }
 0x4d0   : > { %v2198_v10 = vsub.f32 %v4386_v59, %v2171_v39  ;;  %1782 = vst [vmem:[%s4370_s11 + $0x58] sm:$0xff] %v1766_v43  ;;  %v1792_v54 = vpack.c.bf16 %v1766_v43, %v1765_v36 }
 0x4d1   : > { %1976 = vmatmul.bf16.vlgmr.msrb.gmra.mxu3 %v1892_v45 }
 0x4d2   : > { %v4466_v17 = vpop.eup %3345  ;;  %v2218_v25 = vmul.f32 1.442695, %v2198_v10  ;;  %1876 = vmatmul.bf16.gmra.mxu2 %v1792_v54 }
 0x4d3   : > { %2248 = vadd.xlane.f32.xlu0 %v4466_v17 }
 0x4d4   : > { %3349 = vpow2.f32 %v2218_v25 }
 0x4d5   : > { %v3348_v44 = vpop.eup %3347 }
 0x4d6   : > { %v1857_v20 = vpop.f32.mrf.mxu2  ;;  %v1734_v3 = vpop.xlane.xlu0 %1733  ;;  %v1767_v58 = vmul.f32 %v3348_v44, %v4401_v14 }
 0x4d7   : > { %3351 = vrcp.f32 %v1734_v3  ;;  %v2173_v62 = vpop.xlane.xlu2 %2172 }
 0x4d8   : > { %v2199_v59 = vsub.f32 %v4395_v13, %v2173_v62  ;;  %1783 = vst [vmem:[%s4370_s11 + $0x60] sm:$0xff] %v1767_v58 }
 0x4da   : > { %v4472_v1 = vpop.eup %3349  ;;  %v2220_v42 = vmul.f32 1.442695, %v2199_v59 }
 0x4db   : > { %2250 = vadd.xlane.f32.xlu0 %v4472_v1 }
 0x4dc   : > { %3353 = vpow2.f32 %v2220_v42 }
 0x4dd   : > { %v3352_v55 = vpop.eup %3351 }
 0x4de   : > { %v1859_v47 = vpop.f32.mrf.mxu2  ;;  %v1736_v30 = vpop.xlane.xlu0 %1735  ;;  %v1768_v53 = vmul.f32 %v3352_v55, %v4410_v60 }
 0x4df   : > { %v1893_v14 = vpack.c.bf16 %v1859_v47, %v1857_v20  ;;  %3355 = vrcp.f32 %v1736_v30  ;;  %v2175_v19 = vpop.xlane.xlu2 %2174 }
 0x4e0   : > { %v2200_v29 = vsub.f32 %v4405_v49, %v2175_v19  ;;  %1784 = vst [vmem:[%s4370_s11 + $0x68] sm:$0xff] %v1768_v53  ;;  %v1793_v13 = vpack.c.bf16 %v1768_v53, %v1767_v58 }
 0x4e1   : > { %1981 = vmatmul.bf16.gmra.mxu3 %v1893_v14 }
 0x4e2   : > { %v4480_v34 = vpop.eup %3353  ;;  %v2222_v26 = vmul.f32 1.442695, %v2200_v29  ;;  %1881 = vmatmul.bf16.gmra.mxu2 %v1793_v13  ;;  %v3176_v29 = vld [vmem:[#allocation10 + $0x38] sm:$0xff]  ;;  %v4532_v13 = vld [vmem:[%s4710_s8] ss:$0 sm:$0xff] }
 0x4e3   : > { %2252 = vadd.xlane.f32.xlu1 %v4480_v34  ;;  %2188 = vmax.xlane.f32.xlu0 %v4475_v56 }
 0x4e4   : > { %3357 = vpow2.f32 %v2222_v26  ;;  %2504 = vmatpush.bf16.msra.mxu3 %v3176_v29 }
 0x4e5   : > { %v3356_v57 = vpop.eup %3355 }
 0x4e6   : > { %v1862_v60 = vpop.f32.mrf.mxu2  ;;  %v1738_v15 = vpop.xlane.xlu1 %1737  ;;  %v1769_v28 = vmul.f32 %v3356_v57, %v4419_v61  ;;  %v3175_v57 = vld [vmem:[#allocation10 + $0x30] sm:$0xff] }
 0x4e7   : > { %3359 = vrcp.f32 %v1738_v15  ;;  %v2177_v49 = vpop.xlane.xlu0 %2176 }
 0x4e8   : > { %v2201_v23 = vsub.f32 %v4415_v8, %v2177_v49  ;;  %1785 = vst [vmem:[%s4370_s11 + $0x70] sm:$0xff] %v1769_v28  ;;  %2505 = vmatpush.bf16.msra.mxu3 %v3175_v57 }
 0x4ea   : > { %v4489_v37 = vpop.eup %3357  ;;  %v2224_v52 = vmul.f32 1.442695, %v2201_v23 }
 0x4eb   : > { %2254 = vadd.xlane.f32.xlu1 %v4489_v37  ;;  %2190 = vmax.xlane.f32.xlu0 %v4485_v21 }
 0x4ec   : > { %3361 = vpow2.f32 %v2224_v52 }
 0x4ed   : > { %v3360_v35 = vpop.eup %3359 }
 0x4ee   : > { %v1864_v31 = vpop.f32.mrf.mxu2  ;;  %v2243_v16 = vpop.xlane.xlu1 %2242  ;;  %v1770_v61 = vmul.f32 %v3360_v35, %v4426_v18  ;;  %v3174_v35 = vld [vmem:[#allocation10 + $0x28] sm:$0xff] }
 0x4ef   : > { %v1894_v22 = vpack.c.bf16 %v1864_v31, %v1862_v60  ;;  %3363 = vrcp.f32 %v2243_v16  ;;  %v2179_v5 = vpop.xlane.xlu0 %2178  ;;  %2506 = vmatpush.bf16.msra.mxu3 %v3174_v35 }
 0x4f0   : > { %v2202_v4 = vsub.f32 %v4428_v40, %v2179_v5  ;;  %1786 = vst [vmem:[%s4370_s11 + $0x78] sm:$0xff] %v1770_v61  ;;  %v1794_v8 = vpack.c.bf16 %v1770_v61, %v1769_v28  ;;  %v3173_v61 = vld [vmem:[#allocation10 + $0x20] sm:$0xff] }
 0x4f1   : > { %1986 = vmatmul.bf16.gmra.mxu3 %v1894_v22 }
 0x4f2   : > { %v4496_v24 = vpop.eup %3361  ;;  %v2226_v27 = vmul.f32 1.442695, %v2202_v4  ;;  %1886 = vmatmul.bf16.gmra.mxu2 %v1794_v8 }
 0x4f3   : > { %2256 = vadd.xlane.f32.xlu2 %v4496_v24  ;;  %2192 = vmax.xlane.f32.xlu1 %v4498_v63 }
 0x4f4   : > { %3365 = vpow2.f32 %v2226_v27  ;;  %2507 = vmatpush.bf16.msra.mxu3 %v3173_v61 }
 0x4f5   : > { %v3364_v18 = vpop.eup %3363 }
 0x4f6   : > { %v2290_v50 = vmul.f32 %v3364_v18, %v4435_v32  ;;  %v1867_v2 = vpop.f32.mrf.mxu2  ;;  %v2245_v40 = vpop.xlane.xlu2 %2244 }
 0x4f7   : > { %3367 = vrcp.f32 %v2245_v40  ;;  %v2181_v36 = vpop.xlane.xlu1 %2180 }
 0x4f8   : > { %3029 = vst [vmem:[%s4370_s11 + $0x80] sm:$0xff] %v2290_v50  ;;  %v2203_v6 = vsub.f32 %v4438_v12, %v2181_v36 }
 0x4fa   : > { %v4505_v7 = vpop.eup %3365  ;;  %v2228_v9 = vmul.f32 1.442695, %v2203_v6  ;;  %v3171_v6 = vld [vmem:[#allocation10 + $0x10] sm:$0xff] }
 0x4fb   : > { %2258 = vadd.xlane.f32.xlu2 %v4505_v7 }
 0x4fc   : > { %3369 = vpow2.f32 %v2228_v9 }
 0x4fd   : > { %v3368_v46 = vpop.eup %3367 }
 0x4fe   : > { %v2291_v11 = vmul.f32 %v3368_v46, %v4442_v33  ;;  %v1869_v0 = vpop.f32.mrf.mxu2  ;;  %v2247_v43 = vpop.xlane.xlu2 %2246 }
 0x4ff   : > { %v1895_v32 = vpack.c.bf16 %v1869_v0, %v1867_v2  ;;  %3371 = vrcp.f32 %v2247_v43  ;;  %v2183_v45 = vpop.xlane.xlu1 %2182  ;;  %v3172_v2 = vld [vmem:[#allocation10 + $0x18] sm:$0xff] }
 0x500   : > { %3030 = vst [vmem:[%s4370_s11 + $0x88] sm:$0xff] %v2291_v11  ;;  %v2323_v39 = vpack.c.bf16 %v2291_v11, %v2290_v50  ;;  %v2204_v10 = vsub.f32 %v4446_v51, %v2183_v45  ;;  %2508 = vmatpush.bf16.msra.mxu3 %v3172_v2  ;;  %v3170_v45 = vld [vmem:[#allocation10 + $0x8] sm:$0xff] }
 0x501   : > { %1991 = vmatmul.bf16.gmra.mxu3 %v1895_v32 }
 0x502   : > { %v4511_v12 = vpop.eup %3369  ;;  %v2230_v54 = vmul.f32 1.442695, %v2204_v10  ;;  %2387 = vmatmul.bf16.vlgmr.msra.gmra.mxu2 %v2323_v39 }
 0x503   : > { %2260 = vadd.xlane.f32.xlu0 %v4511_v12 }
 0x504   : > { %3373 = vpow2.f32 %v2230_v54  ;;  %2509 = vmatpush.bf16.msra.mxu3 %v3171_v6 }
 0x505   : > { %v3372_v25 = vpop.eup %3371 }
 0x506   : > { %v2185_v33 = vpop.xlane.xlu2 %2184  ;;  %v2292_v44 = vmul.f32 %v3372_v25, %v4448_v48  ;;  %v3169_v25 = vld [vmem:[#allocation10] sm:$0xff] }
 0x507   : > { %v2205_v20 = vsub.f32 %v4452_v38, %v2185_v33 }
 0x508   : > { %3031 = vst [vmem:[%s4370_s11 + $0x90] sm:$0xff] %v2292_v44  ;;  %2510 = vmatpush.bf16.msra.mxu3 %v3170_v45 }
 0x509   : > { %v2232_v3 = vmul.f32 1.442695, %v2205_v20 }
 0x50a   : > { %v4517_v58 = vpop.eup %3373 }
 0x50b   : > { %3375 = vpow2.f32 %v2232_v3  ;;  %2262 = vadd.xlane.f32.xlu1 %v4517_v58 }
 0x50c   : > { %2511 = vmatpush.bf16.msra.mxu3 %v3169_v25 }
 0x50e   : > { %v2187_v51 = vpop.xlane.xlu2 %2186 }
 0x50f   : > { %v2206_v62 = vsub.f32 %v4455_v41, %v2187_v51 }
 0x511   : > { %v4521_v59 = vpop.eup %3375  ;;  %v2234_v42 = vmul.f32 1.442695, %v2206_v62 }
 0x512   : > { %2264 = vadd.xlane.f32.xlu2 %v4521_v59 }
 0x513   : > { %3377 = vpow2.f32 %v2234_v42 }
 0x519   : > { %v4524_v48 = vpop.eup %3377 }
 0x51a   : > { %2266 = vadd.xlane.f32.xlu0 %v4524_v48 }
 0x545   : > { %v1872_v38 = vpop.f32.mrf.mxu2 }
 0x546   : > { %v2249_v55 = vpop.xlane.xlu0 %2248 }
 0x547   : > { %3379 = vrcp.f32 %v2249_v55 }
 0x54d   : > { %v3380_v47 = vpop.eup %3379  ;;  %v1874_v30 = vpop.f32.mrf.mxu2 }
 0x54e   : > { %v1896_v53 = vpack.c.bf16 %v1874_v30, %v1872_v38  ;;  %v2251_v14 = vpop.xlane.xlu0 %2250  ;;  %v2293_v41 = vmul.f32 %v3380_v47, %v4466_v17 }
 0x54f   : > { %3381 = vrcp.f32 %v2251_v14 }
 0x550   : > { %1996 = vmatmul.bf16.gmra.mxu3 %v1896_v53  ;;  %3032 = vst [vmem:[%s4370_s11 + $0x98] sm:$0xff] %v2293_v41  ;;  %v2324_v19 = vpack.c.bf16 %v2293_v41, %v2292_v44 }
 0x552   : > { %2392 = vmatmul.bf16.gmra.mxu2 %v2324_v19 }
 0x554   : > { %v1977_v26 = vpop.f32.mrf.mxu3 }
 0x555   : > { %v3382_v60 = vpop.eup %3381  ;;  %v1978_v15 = vadd.f32 %v4532_v13, %v1977_v26  ;;  %v1877_v17 = vpop.f32.mrf.mxu2 }
 0x556   : > { %v2253_v28 = vpop.xlane.xlu1 %2252  ;;  %v2189_v49 = vpop.xlane.xlu0 %2188  ;;  %v2294_v23 = vmul.f32 %v3382_v60, %v4472_v1 }
 0x557   : > { %2017 = vst [vmem:[%s4538_s3] sm:$0xff] %v1978_v15  ;;  %3383 = vrcp.f32 %v2253_v28  ;;  %v2207_v52 = vsub.f32 %v4475_v56, %v2189_v49 }
 0x558   : > { %3033 = vst [vmem:[%s4370_s11 + $0xa0] sm:$0xff] %v2294_v23 }
 0x559   : > { %v2236_v31 = vmul.f32 1.442695, %v2207_v52 }
 0x55b   : > { %3385 = vpow2.f32 %v2236_v31 }
 0x55c   : > { %v1979_v16 = vpop.f32.mrf.mxu3 }
 0x55d   : > { %v3384_v22 = vpop.eup %3383  ;;  %v1980_v1 = vadd.f32 %v4532_v13, %v1979_v16  ;;  %v1879_v5 = vpop.f32.mrf.mxu2 }
 0x55e   : > { %v1897_v4 = vpack.c.bf16 %v1879_v5, %v1877_v17  ;;  %v2255_v8 = vpop.xlane.xlu1 %2254  ;;  %v2191_v27 = vpop.xlane.xlu0 %2190  ;;  %v2295_v18 = vmul.f32 %v3384_v22, %v4480_v34 }
 0x55f   : > { %2018 = vst [vmem:[%s4538_s3 + $0x8] sm:$0xff] %v1980_v1  ;;  %3387 = vrcp.f32 %v2255_v8  ;;  %v2208_v56 = vsub.f32 %v4485_v21, %v2191_v27 }
 0x560   : > { %2001 = vmatmul.bf16.gmra.mxu3 %v1897_v4  ;;  %3034 = vst [vmem:[%s4370_s11 + $0xa8] sm:$0xff] %v2295_v18  ;;  %v2325_v50 = vpack.c.bf16 %v2295_v18, %v2294_v23 }
 0x561   : > { %v4548_v40 = vpop.eup %3385  ;;  %v2238_v36 = vmul.f32 1.442695, %v2208_v56 }
 0x562   : > { %2397 = vmatmul.bf16.gmra.mxu2 %v2325_v50  ;;  %2268 = vadd.xlane.f32.xlu1 %v4548_v40 }
 0x563   : > { %3389 = vpow2.f32 %v2238_v36 }
 0x564   : > { %v1982_v34 = vpop.f32.mrf.mxu3 }
 0x565   : > { %v3388_v9 = vpop.eup %3387  ;;  %v1983_v46 = vadd.f32 %v4532_v13, %v1982_v34  ;;  %v1882_v21 = vpop.f32.mrf.mxu2 }
 0x566   : > { %v2257_v11 = vpop.xlane.xlu2 %2256  ;;  %v2193_v0 = vpop.xlane.xlu1 %2192  ;;  %v2296_v43 = vmul.f32 %v3388_v9, %v4489_v37 }
 0x567   : > { %2019 = vst [vmem:[%s4538_s3 + $0x10] sm:$0xff] %v1983_v46  ;;  %3391 = vrcp.f32 %v2257_v11  ;;  %v2209_v32 = vsub.f32 %v4498_v63, %v2193_v0 }
 0x568   : > { %3035 = vst [vmem:[%s4370_s11 + $0xb0] sm:$0xff] %v2296_v43 }
 0x569   : > { %v4556_v39 = vpop.eup %3389  ;;  %v2240_v10 = vmul.f32 1.442695, %v2209_v32 }
 0x56a   : > { %2270 = vadd.xlane.f32.xlu2 %v4556_v39 }
 0x56b   : > { %3393 = vpow2.f32 %v2240_v10 }
 0x56c   : > { %v1984_v54 = vpop.f32.mrf.mxu3 }
 0x56d   : > { %v3392_v33 = vpop.eup %3391  ;;  %v1985_v37 = vadd.f32 %v4532_v13, %v1984_v54  ;;  %v1884_v44 = vpop.f32.mrf.mxu2 }
 0x56e   : > { %v1898_v20 = vpack.c.bf16 %v1884_v44, %v1882_v21  ;;  %v2259_v63 = vpop.xlane.xlu2 %2258  ;;  %v2297_v3 = vmul.f32 %v3392_v33, %v4496_v24 }
 0x56f   : > { %2020 = vst [vmem:[%s4538_s3 + $0x18] sm:$0xff] %v1985_v37  ;;  %3395 = vrcp.f32 %v2259_v63 }
 0x570   : > { %2006 = vmatmul.bf16.gmra.mxu3 %v1898_v20  ;;  %3036 = vst [vmem:[%s4370_s11 + $0xb8] sm:$0xff] %v2297_v3  ;;  %v2326_v51 = vpack.c.bf16 %v2297_v3, %v2296_v43 }
 0x571   : > { %v4563_v62 = vpop.eup %3393 }
 0x572   : > { %2402 = vmatmul.bf16.gmra.mxu2 %v2326_v51  ;;  %2272 = vadd.xlane.f32.xlu0 %v4563_v62 }
 0x574   : > { %v1987_v42 = vpop.f32.mrf.mxu3 }
 0x575   : > { %v3396_v38 = vpop.eup %3395  ;;  %v1988_v55 = vadd.f32 %v4532_v13, %v1987_v42  ;;  %v1887_v47 = vpop.f32.mrf.mxu2 }
 0x576   : > { %v2261_v24 = vpop.xlane.xlu0 %2260  ;;  %v2298_v30 = vmul.f32 %v3396_v38, %v4505_v7 }
 0x577   : > { %2021 = vst [vmem:[%s4538_s3 + $0x20] sm:$0xff] %v1988_v55  ;;  %3397 = vrcp.f32 %v2261_v24 }
 0x578   : > { %3037 = vst [vmem:[%s4370_s11 + $0xc0] sm:$0xff] %v2298_v30 }
 0x57c   : > { %v1989_v53 = vpop.f32.mrf.mxu3 }
 0x57d   : > { %v3398_v14 = vpop.eup %3397  ;;  %v1990_v41 = vadd.f32 %v4532_v13, %v1989_v53  ;;  %v1889_v19 = vpop.f32.mrf.mxu2  ;;  %v4609_v53 = vld [vmem:[%s4710_s8] ss:$0 sm:$0xff] }
 0x57e   : > { %v1899_v29 = vpack.c.bf16 %v1889_v19, %v1887_v47  ;;  %v2263_v26 = vpop.xlane.xlu1 %2262  ;;  %v2299_v57 = vmul.f32 %v3398_v14, %v4511_v12 }
 0x57f   : > { %2022 = vst [vmem:[%s4538_s3 + $0x28] sm:$0xff] %v1990_v41  ;;  %3399 = vrcp.f32 %v2263_v26 }
 0x580   : > { %2011 = vmatmul.bf16.gmra.mxu3 %v1899_v29  ;;  %3038 = vst [vmem:[%s4370_s11 + $0xc8] sm:$0xff] %v2299_v57  ;;  %v2327_v60 = vpack.c.bf16 %v2299_v57, %v2298_v30 }
 0x582   : > { %2407 = vmatmul.bf16.gmra.mxu2 %v2327_v60 }
 0x584   : > { %v1992_v7 = vpop.f32.mrf.mxu3 }
 0x585   : > { %v3400_v15 = vpop.eup %3399  ;;  %v1993_v17 = vadd.f32 %v4532_v13, %v1992_v7  ;;  %v2388_v28 = vpop.f32.mrf.mxu2 }
 0x586   : > { %v2265_v49 = vpop.xlane.xlu2 %2264  ;;  %v2300_v23 = vmul.f32 %v3400_v15, %v4517_v58 }
 0x587   : > { %3401 = vrcp.f32 %v2265_v49  ;;  %2023 = vst [vmem:[%s4538_s3 + $0x30] sm:$0xff] %v1993_v17 }
 0x588   : > { %3039 = vst [vmem:[%s4370_s11 + $0xd0] sm:$0xff] %v2300_v23 }
 0x58c   : > { %v1994_v52 = vpop.f32.mrf.mxu3 }
 0x58d   : > { %v3402_v12 = vpop.eup %3401  ;;  %v1995_v35 = vadd.f32 %v4532_v13, %v1994_v52  ;;  %v2390_v31 = vpop.f32.mrf.mxu2 }
 0x58e   : > { %v2267_v16 = vpop.xlane.xlu0 %2266  ;;  %v2301_v61 = vmul.f32 %v3402_v12, %v4521_v59  ;;  %v2428_v22 = vpack.c.bf16 %v2390_v31, %v2388_v28 }
 0x58f   : > { %3403 = vrcp.f32 %v2267_v16  ;;  %2024 = vst [vmem:[%s4538_s3 + $0x38] sm:$0xff] %v1995_v35 }
 0x590   : > { %v2328_v1 = vpack.c.bf16 %v2301_v61, %v2300_v23  ;;  %2512 = vmatmul.bf16.vlgmr.msra.gmra.mxu3 %v2428_v22  ;;  %3040 = vst [vmem:[%s4370_s11 + $0xd8] sm:$0xff] %v2301_v61 }
 0x592   : > { %2412 = vmatmul.bf16.gmra.mxu2 %v2328_v1 }
 0x595   : > { %v3404_v58 = vpop.eup %3403 }
 0x596   : > { %v2302_v5 = vmul.f32 %v3404_v58, %v4524_v48 }
 0x598   : > { %3041 = vst [vmem:[%s4370_s11 + $0xe0] sm:$0xff] %v2302_v5 }
 0x5d3   : > { %v1997_v4 = vpop.f32.mrf.mxu3 }
 0x5d4   : > { %v1998_v8 = vadd.f32 %v4532_v13, %v1997_v4 }
 0x5d5   : > { %v2393_v27 = vpop.f32.mrf.mxu2  ;;  %v2269_v18 = vpop.xlane.xlu1 %2268 }
 0x5d6   : > { %2025 = vst [vmem:[%s4538_s3 + $0x40] sm:$0xff] %v1998_v8  ;;  %3405 = vrcp.f32 %v2269_v18 }
 0x5db   : > { %v1999_v59 = vpop.f32.mrf.mxu3 }
 0x5dc   : > { %v3406_v56 = vpop.eup %3405  ;;  %v2000_v50 = vadd.f32 %v4532_v13, %v1999_v59 }
 0x5dd   : > { %v2395_v2 = vpop.f32.mrf.mxu2  ;;  %v2271_v36 = vpop.xlane.xlu2 %2270  ;;  %v2303_v34 = vmul.f32 %v3406_v56, %v4548_v40 }
 0x5de   : > { %2026 = vst [vmem:[%s4538_s3 + $0x48] sm:$0xff] %v2000_v50  ;;  %v2429_v48 = vpack.c.bf16 %v2395_v2, %v2393_v27  ;;  %3407 = vrcp.f32 %v2271_v36 }
 0x5df   : > { %3042 = vst [vmem:[%s4370_s11 + $0xe8] sm:$0xff] %v2303_v34  ;;  %v2329_v6 = vpack.c.bf16 %v2303_v34, %v2302_v5 }
 0x5e0   : > { %2517 = vmatmul.bf16.gmra.mxu3 %v2429_v48 }
 0x5e1   : > { %2417 = vmatmul.bf16.gmra.mxu2 %v2329_v6 }
 0x5e3   : > { %v2002_v9 = vpop.f32.mrf.mxu3 }
 0x5e4   : > { %v3408_v46 = vpop.eup %3407  ;;  %v2003_v21 = vadd.f32 %v4532_v13, %v2002_v9 }
 0x5e5   : > { %v2398_v11 = vpop.f32.mrf.mxu2  ;;  %v2273_v0 = vpop.xlane.xlu0 %2272  ;;  %v2304_v43 = vmul.f32 %v3408_v46, %v4556_v39 }
 0x5e6   : > { %2027 = vst [vmem:[%s4538_s3 + $0x50] sm:$0xff] %v2003_v21  ;;  %3409 = vrcp.f32 %v2273_v0 }
 0x5e7   : > { %3043 = vst [vmem:[%s4370_s11 + $0xf0] sm:$0xff] %v2304_v43 }
 0x5eb   : > { %v2004_v40 = vpop.f32.mrf.mxu3 }
 0x5ec   : > { %v3410_v32 = vpop.eup %3409  ;;  %v2005_v45 = vadd.f32 %v4532_v13, %v2004_v40 }
 0x5ed   : > { %v2400_v10 = vpop.f32.mrf.mxu2  ;;  %v2305_v54 = vmul.f32 %v3410_v32, %v4563_v62 }
 0x5ee   : > { %2028 = vst [vmem:[%s4538_s3 + $0x58] sm:$0xff] %v2005_v45  ;;  %v2430_v25 = vpack.c.bf16 %v2400_v10, %v2398_v11 }
 0x5ef   : > { %3044 = vst [vmem:[%s4370_s11 + $0xf8] sm:$0xff] %v2305_v54  ;;  %v2330_v33 = vpack.c.bf16 %v2305_v54, %v2304_v43 }
 0x5f0   : > { %2522 = vmatmul.bf16.gmra.mxu3 %v2430_v25 }
 0x5f1   : > { %2422 = vmatmul.bf16.gmra.mxu2 %v2330_v33 }
 0x5f3   : > { %v2007_v39 = vpop.f32.mrf.mxu3 }
 0x5f4   : > { %v2008_v37 = vadd.f32 %v4532_v13, %v2007_v39 }
 0x5f5   : > { %v2403_v44 = vpop.f32.mrf.mxu2 }
 0x5f6   : > { %2029 = vst [vmem:[%s4538_s3 + $0x60] sm:$0xff] %v2008_v37 }
 0x5fb   : > { %v2009_v20 = vpop.f32.mrf.mxu3 }
 0x5fc   : > { %v2010_v63 = vadd.f32 %v4532_v13, %v2009_v20 }
 0x5fd   : > { %v2405_v3 = vpop.f32.mrf.mxu2 }
 0x5fe   : > { %2030 = vst [vmem:[%s4538_s3 + $0x68] sm:$0xff] %v2010_v63  ;;  %v2431_v51 = vpack.c.bf16 %v2405_v3, %v2403_v44 }
 0x600   : > { %2527 = vmatmul.bf16.gmra.mxu3 %v2431_v51 }
 0x603   : > { %v2012_v62 = vpop.f32.mrf.mxu3 }
 0x604   : > { %v2013_v42 = vadd.f32 %v4532_v13, %v2012_v62 }
 0x605   : > { %v2408_v38 = vpop.f32.mrf.mxu2 }
 0x606   : > { %2031 = vst [vmem:[%s4538_s3 + $0x70] sm:$0xff] %v2013_v42 }
 0x60b   : > { %v2014_v55 = vpop.f32.mrf.mxu3 }
 0x60c   : > { %v2015_v47 = vadd.f32 %v4532_v13, %v2014_v55 }
 0x60d   : > { %v2410_v24 = vpop.f32.mrf.mxu2 }
 0x60e   : > { %2032 = vst [vmem:[%s4538_s3 + $0x78] sm:$0xff] %v2015_v47  ;;  %v2432_v30 = vpack.c.bf16 %v2410_v24, %v2408_v38 }
 0x610   : > { %2532 = vmatmul.bf16.gmra.mxu3 %v2432_v30 }
 0x613   : > { %v2513_v14 = vpop.f32.mrf.mxu3 }
 0x614   : > { %v2514_v41 = vadd.f32 %v4609_v53, %v2513_v14 }
 0x615   : > { %v2413_v19 = vpop.f32.mrf.mxu2 }
 0x616   : > { %3077 = vst [vmem:[%s4538_s3 + $0x80] sm:$0xff] %v2514_v41 }
 0x61b   : > { %v2515_v29 = vpop.f32.mrf.mxu3 }
 0x61c   : > { %v2516_v26 = vadd.f32 %v4609_v53, %v2515_v29 }
 0x61d   : > { %v2415_v13 = vpop.f32.mrf.mxu2 }
 0x61e   : > { %3078 = vst [vmem:[%s4538_s3 + $0x88] sm:$0xff] %v2516_v26  ;;  %v2433_v57 = vpack.c.bf16 %v2415_v13, %v2413_v19 }
 0x620   : > { %2537 = vmatmul.bf16.gmra.mxu3 %v2433_v57 }
 0x663   : > { %v2518_v60 = vpop.f32.mrf.mxu3 }
 0x664   : > { %v2519_v7 = vadd.f32 %v4609_v53, %v2518_v60  ;;  %v2418_v15 = vpop.f32.mrf.mxu2 }
 0x666   : > { %3079 = vst [vmem:[%s4538_s3 + $0x90] sm:$0xff] %v2519_v7 }
 0x66b   : > { %v2520_v17 = vpop.f32.mrf.mxu3 }
 0x66c   : > { %v2521_v28 = vadd.f32 %v4609_v53, %v2520_v17  ;;  %v2420_v49 = vpop.f32.mrf.mxu2 }
 0x66d   : > { %v2434_v23 = vpack.c.bf16 %v2420_v49, %v2418_v15 }
 0x66e   : > { %3080 = vst [vmem:[%s4538_s3 + $0x98] sm:$0xff] %v2521_v28 }
 0x66f   : > { %2542 = vmatmul.bf16.gmra.mxu3 %v2434_v23 }
 0x673   : > { %v2523_v12 = vpop.f32.mrf.mxu3 }
 0x674   : > { %v2524_v52 = vadd.f32 %v4609_v53, %v2523_v12  ;;  %v2423_v35 = vpop.f32.mrf.mxu2 }
 0x676   : > { %3081 = vst [vmem:[%s4538_s3 + $0xa0] sm:$0xff] %v2524_v52 }
 0x67b   : > { %v2525_v31 = vpop.f32.mrf.mxu3 }
 0x67c   : > { %v2526_v16 = vadd.f32 %v4609_v53, %v2525_v31  ;;  %v2425_v61 = vpop.f32.mrf.mxu2 }
 0x67d   : > { %v2435_v22 = vpack.c.bf16 %v2425_v61, %v2423_v35 }
 0x67e   : > { %3082 = vst [vmem:[%s4538_s3 + $0xa8] sm:$0xff] %v2526_v16 }
 0x67f   : > { %2547 = vmatmul.bf16.gmra.mxu3 %v2435_v22 }
 0x683   : > { %v2528_v1 = vpop.f32.mrf.mxu3 }
 0x684   : > { %v2529_v58 = vadd.f32 %v4609_v53, %v2528_v1 }
 0x686   : > { %3083 = vst [vmem:[%s4538_s3 + $0xb0] sm:$0xff] %v2529_v58 }
 0x68b   : > { %v2530_v5 = vpop.f32.mrf.mxu3 }
 0x68c   : > { %v2531_v4 = vadd.f32 %v4609_v53, %v2530_v5 }
 0x68e   : > { %3084 = vst [vmem:[%s4538_s3 + $0xb8] sm:$0xff] %v2531_v4 }
 0x68f   : > { %3588 = shalt.err (!%p3585_p10)
}
 0x690   : > { %s3677_s11 = smov 128   ;;  %s3678_s15 = smov 8  }
 0x691   : > { %3200 = dma.vmem_to_hbm [thread:$0]  (%p3827_p3), %s2608_s7, 4096, %s2610_s19, %s2576_s24, %s3677_s11, %s3677_s11, %s3678_s15  }
 0x692   : > { %s2588_s7 = scalar_lea.hbm %s4711_s9, %s3178_s23  ;;  %s2589_s19 = sshll.u32 %s4538_s3, 4  ;;  %s2590_s19 = int_to_ptr.vmem [resolvable:$true] %s2589_s19 }
 0x693   : > { %v2533_v8 = vpop.f32.mrf.mxu3  ;;  %s2591_s24 = sshll.u32 %s2588_s7, 4  ;;  %s2571_s30 = scalar_lea.sflag [#allocation4], %s3860_s27  ;;  %s2592_s24 = int_to_ptr.hbm [resolvable:$true] %s2591_s24 }
 0x694   : > { %v2534_v27 = vadd.f32 %v4609_v53, %v2533_v8  ;;  %s3603_s21 = sshra.s32 %s2592_s24, 4  ;;  %s3609_s23 = scalar_lea.hbm %s4711_s9, 512  ;;  %s3604_s21 = int_to_ptr.hbm [resolvable:$true] %s3603_s21 }
 0x695   : > { %s3605_s29 = scalar_lea.hbm %s3604_s21, 256  ;;  %p3610_p5 = scmp.lt.s32.totalorder %s3604_s21, %s4711_s9 }
 0x696   : > { %3085 = vst [vmem:[%s4538_s3 + $0xc0] sm:$0xff] %v2534_v27  ;;  %p3606_p12 = scmp.ne.s32.totalorder %s3604_s21, %s3605_s29  ;;  %p3611_p7 = scmp.lt.s32.totalorder %s3609_s23, %s3605_s29 }
 0x698   : > { %p3607_p13 = pnand %p3606_p12, %p3827_p3  ;;  %p3612_p1 = por %p3611_p7, %p3610_p5 }
 0x69a   : > { %p3608_p0 = pneg %p3607_p13 }
 0x69b   : > { %v2535_v18 = vpop.f32.mrf.mxu3 }
 0x69c   : > { %v2536_v59 = vadd.f32 %v4609_v53, %v2535_v18  ;;  %p3613_p4 = pnand %p3612_p1, %p3608_p0 }
 0x69e   : > { %3086 = vst [vmem:[%s4538_s3 + $0xc8] sm:$0xff] %v2536_v59 }
 0x6a3   : > { %v2538_v56 = vpop.f32.mrf.mxu3 }
 0x6a4   : > { %v2539_v50 = vadd.f32 %v4609_v53, %v2538_v56 }
 0x6a6   : > { %3087 = vst [vmem:[%s4538_s3 + $0xd0] sm:$0xff] %v2539_v50 }
 0x6ab   : > { %v2540_v2 = vpop.f32.mrf.mxu3 }
 0x6ac   : > { %v2541_v36 = vadd.f32 %v4609_v53, %v2540_v2 }
 0x6ae   : > { %3088 = vst [vmem:[%s4538_s3 + $0xd8] sm:$0xff] %v2541_v36 }
 0x6f2   : > { %v2543_v34 = vpop.f32.mrf.mxu3 }
 0x6f3   : > { %v2544_v48 = vadd.f32 %v4609_v53, %v2543_v34 }
 0x6f5   : > { %3089 = vst [vmem:[%s4538_s3 + $0xe0] sm:$0xff] %v2544_v48 }
 0x6fa   : > { %v2545_v6 = vpop.f32.mrf.mxu3 }
 0x6fb   : > { %v2546_v9 = vadd.f32 %v4609_v53, %v2545_v6 }
 0x6fd   : > { %3090 = vst [vmem:[%s4538_s3 + $0xe8] sm:$0xff] %v2546_v9 }
 0x702   : > { %v2548_v46 = vpop.f32.mrf.mxu3 }
 0x703   : > { %v2549_v21 = vadd.f32 %v4609_v53, %v2548_v46 }
 0x705   : > { %3091 = vst [vmem:[%s4538_s3 + $0xf0] sm:$0xff] %v2549_v21 }
 0x70a   : > { %v2550_v11 = vpop.f32.mrf.mxu3 }
 0x70b   : > { %v2551_v0 = vadd.f32 %v4609_v53, %v2550_v11 }
 0x70d   : > { %3092 = vst [vmem:[%s4538_s3 + $0xf8] sm:$0xff] %v2551_v0 }
 0x70e   : > { %3616 = shalt.err (!%p3613_p4)
}
 0x70f   : > { %3199 = dma.vmem_to_hbm [thread:$0]  (%p3827_p3), %s2590_s19, 4096, %s2592_s24, %s2571_s30, %s3677_s11, %s3677_s11, %s3678_s15  }
 0x710 PF: > { %s2624_s27 = sand.u32 1, %s3655_s13   ;;  %p4738_p8 = scmp.ge.s32.totalorder %s3667_s16, 2 }
 0x711   : > { %s2625_s3 = scalar_lea.sflag [#allocation4], %s2624_s27 }
 0x712   : > { %p3221_p11 = pnand %p4738_p8, %p3769_p6 }
 0x714   : > { %p3222_p2 = pneg %p3221_p11 }
 0x716   : > { %3646 = dma.done.wait (%p3222_p2), %s2625_s3, 4096  }
 0x717   : > { %3648 = vsyncadd (%p3222_p2), %s2625_s3, 4294963200  ;;  %s2635_s22 = scalar_lea.sflag [#allocation13], %s2624_s27 }
 0x718   : > { %3650 = dma.done.wait (%p3222_p2), %s2635_s22, 4096  }
 0x719   : > { %3652 = vsyncadd (%p3222_p2), %s2635_s22, 4294963200  ;;  %s4739_s1 = sld [smem:[#allocation19_spill]]  ;;  %p29_p3 = scmp.ge.s32.totalorder %s3817_s28, 4  }
 0x71a   : > { %s4740_s15 = sld [smem:[#allocation20_spill]]  ;;  %s4741_s13 = smov %s3659_s14 }
 0x71b   : > { %s4743_s16 = smov %s3817_s28  ;;  %31 = sbr.rel (!%p29_p3) target bundleno = 14 (0xe), region = 136 }
 0x71f   : > { %s4742_s14 = smov %s4739_s1 }
 0x720   :  { %2641 = vsyncpa [#allocation3], 1 }
 0x721   :  { %2643 = vsyncpa [#allocation3 + $0x1], 1 }
 0x722   :  { %2644 = vsyncpa [#allocation6], 1 }
 0x723   :  { %2645 = vsyncpa [#allocation9], 1 }
 0x724   :  { %2646 = vsyncpa [#allocation4], 1 }
 0x725   :  { %2648 = vsyncpa [#allocation4 + $0x1], 1 }
 0x726   :  { %2649 = vsyncpa [#allocation13], 1 }
 0x727   :  { %2651 = vsyncpa [#allocation13 + $0x1], 1 }

</bundles_post_ra>
